<compile_context>
chip_gen: v7x
topology: tpu7x:2x2x1
jax: 0.10.0
libtpu: 0.0.40
codegen_flags: <defaults>
</compile_context>

<pallas_src>
import functools
import math

import jax
import jax.numpy as jnp
from jax.experimental import pallas as pl
from jax.experimental.pallas import tpu as pltpu

BN_EPS = 1e-5
LANE = 128


# --------------------------------------------------------------------------
# helpers
# --------------------------------------------------------------------------
def _round_up(n, m):
    return ((n + m - 1) // m) * m


def _pad_to(a, shape):
    return jnp.pad(a, [(0, t - s) for s, t in zip(a.shape, shape)])


def _fold_bn(w, bn):
    # w: [..., Cout] ; fold eval-mode BN scale into the weight, return bias.
    scale = bn["gamma"] / jnp.sqrt(bn["var"] + BN_EPS)
    return w * scale, bn["beta"] - bn["mean"] * scale


# --------------------------------------------------------------------------
# fused SEBottleneck kernel (stride == 1)
# --------------------------------------------------------------------------
def _se_bottleneck_kernel(*refs, H, W, c_out, has_downsample):
    if has_downsample:
        (x_ref, w1_ref, b1_ref, w2_ref, b2_ref, w3_ref, b3_ref,
         wse1_ref, bse1_ref, wse2_ref, bse2_ref, wd_ref, bd_ref, o_ref) = refs
    else:
        (x_ref, w1_ref, b1_ref, w2_ref, b2_ref, w3_ref, b3_ref,
         wse1_ref, bse1_ref, wse2_ref, bse2_ref, o_ref) = refs
        wd_ref = bd_ref = None

    HW = H * W
    cin_p = x_ref.shape[-1]
    p_p = w1_ref.shape[-1]
    c4_p = w3_ref.shape[-1]

    # ---- conv1 (1x1) + bn1 + ReLU -----------------------------------------
    x2d = x_ref[0].reshape(HW, cin_p)                              # bf16
    h1 = jnp.dot(x2d, w1_ref[...], preferred_element_type=jnp.float32)
    h1 = jnp.maximum(h1 + b1_ref[...], 0.0)                        # [HW, Pp] f32

    # ---- conv2 (3x3, pad=1, stride=1) + bn2 + ReLU ------------------------
    # Horizontal (x +/- 1) shifted views in flattened (y*W + x) row order;
    # wrap across row boundaries is killed by the column mask.
    col = jax.lax.broadcasted_iota(jnp.int32, (HW, 1), 0) % W
    zrow = jnp.zeros((1, p_p), jnp.float32)
    xm1 = jnp.concatenate([zrow, h1[:HW - 1, :]], axis=0)          # in[y, x-1]
    xm1 = jnp.where(col == 0, 0.0, xm1)
    xp1 = jnp.concatenate([h1[1:, :], zrow], axis=0)               # in[y, x+1]
    xp1 = jnp.where(col == W - 1, 0.0, xp1)

    # Single large-K matmul: [HW, 3*Pp] x [3*Pp (dx,ci), 3*Pp (dy,co)].
    hcat = jnp.concatenate([xm1, h1, xp1], axis=1).astype(jnp.bfloat16)
    m = jnp.dot(hcat, w2_ref[...], preferred_element_type=jnp.float32)

    # Combine the three dy column blocks with aligned row shifts (+/- W rows).
    m0 = m[:, 0 * p_p:1 * p_p]        # dy = 0 taps (needs in[y-1, ...])
    m1 = m[:, 1 * p_p:2 * p_p]        # dy = 1 taps
    m2 = m[:, 2 * p_p:3 * p_p]        # dy = 2 taps (needs in[y+1, ...])
    zrows = jnp.zeros((W, p_p), jnp.float32)
    acc = m1
    acc = acc + jnp.concatenate([zrows, m0[:HW - W, :]], axis=0)
    acc = acc + jnp.concatenate([m2[W:, :], zrows], axis=0)
    h2 = jnp.maximum(acc + b2_ref[...], 0.0).astype(jnp.bfloat16)  # [HW, Pp]

    # ---- conv3 (1x1) + bn3 -------------------------------------------------
    y3 = jnp.dot(h2, w3_ref[...],
                 preferred_element_type=jnp.float32) + b3_ref[...]  # [HW, C4p]

    # ---- SE: global avg pool -> FC -> ReLU -> FC -> sigmoid -> scale ------
    pooled = jnp.mean(y3, axis=0, keepdims=True)                   # [1, C4p]
    s = jnp.dot(pooled.astype(jnp.bfloat16), wse1_ref[...],
                preferred_element_type=jnp.float32) + bse1_ref[...]
    s = jnp.maximum(s, 0.0)
    s = jnp.dot(s.astype(jnp.bfloat16), wse2_ref[...],
                preferred_element_type=jnp.float32) + bse2_ref[...]
    s = jax.nn.sigmoid(s)                                          # f32
    y = y3 * s                                                     # channel scale

    # ---- residual (optional in-kernel 1x1 conv + BN downsample) + ReLU ----
    if has_downsample:
        res = jnp.dot(x2d, wd_ref[...],
                      preferred_element_type=jnp.float32) + bd_ref[...]
    else:
        res = x2d.astype(jnp.float32)      # identity: Cin_p == C4p

    out = jnp.maximum(y + res, 0.0).reshape(H, W, c4_p)
    if c_out != c4_p:                      # store only the true channels
        out = out[:, :, :c_out]
    o_ref[0] = out.astype(o_ref.dtype)


# --------------------------------------------------------------------------
# wrapper: trace-time BN folding / padding / bf16 cast + pallas_call
# --------------------------------------------------------------------------
@functools.partial(jax.jit, static_argnames=("stride",))
def se_bottleneck(x_nhwc, params, *, stride=1):
    """Fused SEBottleneck forward.  x_nhwc: [N, H, W, Cin] (NHWC)."""
    if stride != 1:
        raise NotImplementedError(
            "TODO(synk): stride>1 fused path not implemented")
    N, H, W, Cin = x_nhwc.shape
    P = params["conv1_w"].shape[1]
    C4 = params["conv3_w"].shape[1]
    R = params["se_w1"].shape[1]
    has_down = "down_w" in params
    if not has_down:
        assert Cin == C4, "identity residual needs matching channel counts"

    cin_p = _round_up(Cin, LANE)
    p_p = _round_up(P, LANE)
    c4_p = _round_up(C4, LANE)
    r_p = _round_up(R, LANE)

    # fold BN into the conv weights, zero-pad channel dims, cast to bf16.
    w1, b1 = _fold_bn(params["conv1_w"], params["bn1"])            # [Cin,P],[P]
    w2, b2 = _fold_bn(params["conv2_w"], params["bn2"])            # [3,3,P,P]
    w3, b3 = _fold_bn(params["conv3_w"], params["bn3"])            # [P,C4],[C4]

    def wprep(w, shape):
        return _pad_to(w, shape).astype(jnp.bfloat16)

    def bprep(b, n):
        return _pad_to(b, (n,)).reshape(1, n).astype(jnp.float32)

    # conv2 weights repacked for the single large-K matmul:
    #   w2cat[dx*Pp + ci, dy*Pp + co] = w2[dy, dx, ci, co]
    w2p = _pad_to(w2, (3, 3, p_p, p_p))
    w2cat = jnp.transpose(w2p, (1, 2, 0, 3)).reshape(3 * p_p, 3 * p_p)
    w2cat = w2cat.astype(jnp.bfloat16)

    # bf16 activation input (halves the input DMA); channel-pad to a lane.
    x_in = _pad_to(x_nhwc, (N, H, W, cin_p)).astype(jnp.bfloat16)

    args = [
        x_in,
        wprep(w1, (cin_p, p_p)), bprep(b1, p_p),
        w2cat, bprep(b2, p_p),
        wprep(w3, (p_p, c4_p)), bprep(b3, c4_p),
        wprep(params["se_w1"], (c4_p, r_p)), bprep(params["se_b1"], r_p),
        wprep(params["se_w2"], (r_p, c4_p)), bprep(params["se_b2"], c4_p),
    ]
    in_specs = [
        pl.BlockSpec((1, H, W, cin_p), lambda n: (n, 0, 0, 0)),
        pl.BlockSpec((cin_p, p_p), lambda n: (0, 0)),
        pl.BlockSpec((1, p_p), lambda n: (0, 0)),
        pl.BlockSpec((3 * p_p, 3 * p_p), lambda n: (0, 0)),
        pl.BlockSpec((1, p_p), lambda n: (0, 0)),
        pl.BlockSpec((p_p, c4_p), lambda n: (0, 0)),
        pl.BlockSpec((1, c4_p), lambda n: (0, 0)),
        pl.BlockSpec((c4_p, r_p), lambda n: (0, 0)),
        pl.BlockSpec((1, r_p), lambda n: (0, 0)),
        pl.BlockSpec((r_p, c4_p), lambda n: (0, 0)),
        pl.BlockSpec((1, c4_p), lambda n: (0, 0)),
    ]
    if has_down:
        wd, bd = _fold_bn(params["down_w"], params["down_bn"])     # [Cin,C4]
        args += [wprep(wd, (cin_p, c4_p)), bprep(bd, c4_p)]
        in_specs += [pl.BlockSpec((cin_p, c4_p), lambda n: (0, 0)),
                     pl.BlockSpec((1, c4_p), lambda n: (0, 0))]

    kernel = functools.partial(
        _se_bottleneck_kernel, H=H, W=W, c_out=C4, has_downsample=has_down)

    out = pl.pallas_call(
        kernel,
        grid=(N,),
        in_specs=in_specs,
        # Unpadded output (masked lane store when C4 < 128): avoids writing a
        # padded tensor + an extra XLA slice round trip through HBM.
        out_specs=pl.BlockSpec((1, H, W, C4), lambda n: (n, 0, 0, 0)),
        out_shape=jax.ShapeDtypeStruct((N, H, W, C4), jnp.float32),
        compiler_params=pltpu.CompilerParams(
            dimension_semantics=("parallel",),
            vmem_limit_bytes=32 * 1024 * 1024),
    )(*args)
    return out


# --------------------------------------------------------------------------
# pure-JAX f32 reference (same semantics as the PyTorch module, eval-mode BN)
# --------------------------------------------------------------------------
def se_bottleneck_reference(x_nhwc, params, *, stride=1):
    def bn(y, p):
        scale = p["gamma"] / jnp.sqrt(p["var"] + BN_EPS)
        return y * scale + (p["beta"] - p["mean"] * scale)

    out = jnp.einsum("nhwc,cp->nhwp", x_nhwc, params["conv1_w"])
    out = jax.nn.relu(bn(out, params["bn1"]))
    out = jax.lax.conv_general_dilated(
        out, params["conv2_w"], window_strides=(stride, stride),
        padding=((1, 1), (1, 1)), dimension_numbers=("NHWC", "HWIO", "NHWC"))
    out = jax.nn.relu(bn(out, params["bn2"]))
    out = jnp.einsum("nhwc,cp->nhwp", out, params["conv3_w"])
    out = bn(out, params["bn3"])

    pooled = out.mean(axis=(1, 2))
    s = jax.nn.relu(pooled @ params["se_w1"] + params["se_b1"])
    s = jax.nn.sigmoid(s @ params["se_w2"] + params["se_b2"])
    out = out * s[:, None, None, :]

    if "down_w" in params:
        res = jnp.einsum("nhwc,cp->nhwp",
                         x_nhwc[:, ::stride, ::stride, :], params["down_w"])
        res = bn(res, params["down_bn"])
    else:
        res = x_nhwc
    return jax.nn.relu(out + res)


# --------------------------------------------------------------------------
# deterministic parameter initialization (shapes follow the nn.Module)
# --------------------------------------------------------------------------
def _bn_params(key, c):
    k1, k2, k3, k4 = jax.random.split(key, 4)
    return dict(
        gamma=jax.random.uniform(k1, (c,), jnp.float32, 0.5, 1.5),
        beta=0.1 * jax.random.normal(k2, (c,), jnp.float32),
        mean=0.1 * jax.random.normal(k3, (c,), jnp.float32),
        var=jax.random.uniform(k4, (c,), jnp.float32, 0.5, 1.5),
    )


def init_block_params(key, inplanes, planes, *, reduction=16, with_downsample=False):
    c4 = planes * 4                         # expansion = 4
    r = max(c4 // reduction, 1)
    ks = jax.random.split(key, 12)
    p = dict(
        conv1_w=math.sqrt(2.0 / inplanes)
        * jax.random.normal(ks[0], (inplanes, planes), jnp.float32),
        bn1=_bn_params(ks[1], planes),
        conv2_w=math.sqrt(2.0 / (9 * planes))
        * jax.random.normal(ks[2], (3, 3, planes, planes), jnp.float32),
        bn2=_bn_params(ks[3], planes),
        conv3_w=math.sqrt(2.0 / planes)
        * jax.random.normal(ks[4], (planes, c4), jnp.float32),
        bn3=_bn_params(ks[5], c4),
    )
    b1 = 1.0 / math.sqrt(c4)
    b2 = 1.0 / math.sqrt(r)
    p["se_w1"] = jax.random.uniform(ks[6], (c4, r), jnp.float32, -b1, b1)
    p["se_b1"] = jax.random.uniform(ks[7], (r,), jnp.float32, -b1, b1)
    p["se_w2"] = jax.random.uniform(ks[8], (r, c4), jnp.float32, -b2, b2)
    p["se_b2"] = jax.random.uniform(ks[9], (c4,), jnp.float32, -b2, b2)
    if with_downsample:
        p["down_w"] = math.sqrt(2.0 / inplanes) \
            * jax.random.normal(ks[10], (inplanes, c4), jnp.float32)
        p["down_bn"] = _bn_params(ks[11], c4)
    return p


# --------------------------------------------------------------------------
if __name__ == "__main__":
    root = jax.random.PRNGKey(0)
    kp_a, kx_a, kp_b, kx_b = jax.random.split(root, 4)

    # Case A: default module args (stride=1, downsample=None); inplanes must
    # equal planes * expansion for the identity residual.
    params_a = init_block_params(kp_a, inplanes=64, planes=16, reduction=16,
                                 with_downsample=False)
    x_a = jax.random.normal(kx_a, (2, 64, 16, 16), jnp.float32)    # NCHW
    x_a = jnp.transpose(x_a, (0, 2, 3, 1))                         # -> NHWC
    out_a = se_bottleneck(x_a, params_a, stride=1)
    jax.block_until_ready(out_a)
    ref_a = se_bottleneck_reference(x_a, params_a, stride=1)
    assert out_a.shape == (2, 16, 16, 64) and out_a.dtype == jnp.float32
    # Tolerance covers the bf16-MXU / bf16-input rounding model.
    assert bool(jnp.allclose(out_a, ref_a, atol=1e-1, rtol=1e-1)), \
        float(jnp.max(jnp.abs(out_a - ref_a)))

    # Case B: channel-changing block -> downsample = 1x1 conv + BN (stride=1).
    params_b = init_block_params(kp_b, inplanes=32, planes=16, reduction=16,
                                 with_downsample=True)
    x_b = jax.random.normal(kx_b, (2, 32, 16, 16), jnp.float32)    # NCHW
    x_b = jnp.transpose(x_b, (0, 2, 3, 1))
    out_b = se_bottleneck(x_b, params_b, stride=1)
    jax.block_until_ready(out_b)
    ref_b = se_bottleneck_reference(x_b, params_b, stride=1)
    assert out_b.shape == (2, 16, 16, 64) and out_b.dtype == jnp.float32
    assert bool(jnp.allclose(out_b, ref_b, atol=1e-1, rtol=1e-1)), \
        float(jnp.max(jnp.abs(out_b - ref_b)))

    print("KERNEL_OK")
</pallas_src>

<mosaic_0001>
module attributes {stable_mosaic.version = 11 : i64} {
  func.func @_se_bottleneck_kernel(%arg0: i32, %arg1: memref<1x16x16x128xbf16, #tpu.memory_space<vmem>>, %arg2: memref<128x128xbf16, #tpu.memory_space<vmem>>, %arg3: memref<1x128xf32, #tpu.memory_space<vmem>>, %arg4: memref<384x384xbf16, #tpu.memory_space<vmem>>, %arg5: memref<1x128xf32, #tpu.memory_space<vmem>>, %arg6: memref<128x128xbf16, #tpu.memory_space<vmem>>, %arg7: memref<1x128xf32, #tpu.memory_space<vmem>>, %arg8: memref<128x128xbf16, #tpu.memory_space<vmem>>, %arg9: memref<1x128xf32, #tpu.memory_space<vmem>>, %arg10: memref<128x128xbf16, #tpu.memory_space<vmem>>, %arg11: memref<1x128xf32, #tpu.memory_space<vmem>>, %arg12: memref<1x16x16x64xf32, #tpu.memory_space<vmem>>) attributes {dimension_semantics = [#tpu.dimension_semantics<parallel>], iteration_bounds = array<i64: 2>, scalar_prefetch = 0 : i64, scratch_operands = 0 : i64, tpu.core_type = #tpu.core_type<tc>, window_params = [{transform_indices = @transform_0, window_bounds = array<i64: 1, 16, 16, 128>}, {pipeline_mode = #tpu.pipeline_mode<synchronous>, transform_indices = @transform_1, window_bounds = array<i64: 128, 128>}, {pipeline_mode = #tpu.pipeline_mode<synchronous>, transform_indices = @transform_2, window_bounds = array<i64: 1, 128>}, {pipeline_mode = #tpu.pipeline_mode<synchronous>, transform_indices = @transform_3, window_bounds = array<i64: 384, 384>}, {pipeline_mode = #tpu.pipeline_mode<synchronous>, transform_indices = @transform_4, window_bounds = array<i64: 1, 128>}, {pipeline_mode = #tpu.pipeline_mode<synchronous>, transform_indices = @transform_5, window_bounds = array<i64: 128, 128>}, {pipeline_mode = #tpu.pipeline_mode<synchronous>, transform_indices = @transform_6, window_bounds = array<i64: 1, 128>}, {pipeline_mode = #tpu.pipeline_mode<synchronous>, transform_indices = @transform_7, window_bounds = array<i64: 128, 128>}, {pipeline_mode = #tpu.pipeline_mode<synchronous>, transform_indices = @transform_8, window_bounds = array<i64: 1, 128>}, {pipeline_mode = #tpu.pipeline_mode<synchronous>, transform_indices = @transform_9, window_bounds = array<i64: 128, 128>}, {pipeline_mode = #tpu.pipeline_mode<synchronous>, transform_indices = @transform_10, window_bounds = array<i64: 1, 128>}, {transform_indices = @transform_11, window_bounds = array<i64: 1, 16, 16, 64>}]} {
    %c0 = arith.constant 0 : index
    %c0_0 = arith.constant 0 : index
    %c0_1 = arith.constant 0 : index
    %c0_2 = arith.constant 0 : index
    %0 = vector.load %arg1[%c0, %c0_0, %c0_1, %c0_2] : memref<1x16x16x128xbf16, #tpu.memory_space<vmem>>, vector<1x16x16x128xbf16>
    %1 = vector.shape_cast %0 : vector<1x16x16x128xbf16> to vector<16x16x128xbf16>
    %2 = vector.shape_cast %1 : vector<16x16x128xbf16> to vector<256x128xbf16>
    %c0_3 = arith.constant 0 : index
    %c0_4 = arith.constant 0 : index
    %3 = vector.load %arg2[%c0_3, %c0_4] : memref<128x128xbf16, #tpu.memory_space<vmem>>, vector<128x128xbf16>
    %cst = arith.constant dense<0.000000e+00> : vector<256x128xf32>
    %4 = tpu.matmul %2, %3, %cst {dimension_numbers = #tpu.dot_dimension_numbers<[1], [0], [0], [1], [0, 0, 1, 1], [], []>} : vector<256x128xbf16>, vector<128x128xbf16>, vector<256x128xf32> -> vector<256x128xf32>
    %c0_5 = arith.constant 0 : index
    %c0_6 = arith.constant 0 : index
    %5 = vector.load %arg3[%c0_5, %c0_6] : memref<1x128xf32, #tpu.memory_space<vmem>>, vector<1x128xf32>
    %6 = vector.broadcast %5 : vector<1x128xf32> to vector<256x128xf32>
    %7 = arith.addf %4, %6 : vector<256x128xf32>
    %cst_7 = arith.constant 0.000000e+00 : f32
    %8 = vector.broadcast %cst_7 : f32 to vector<256x128xf32>
    %9 = arith.maximumf %7, %8 : vector<256x128xf32>
    %10 = tpu.iota {dimensions = array<i32: 0>} : vector<256x1xi32>
    %c16_i32 = arith.constant 16 : i32
    %c0_i32 = arith.constant 0 : i32
    %11 = arith.cmpi eq, %c16_i32, %c0_i32 : i32
    %c1_i32 = arith.constant 1 : i32
    %12 = arith.select %11, %c1_i32, %c16_i32 : i32
    %13 = vector.broadcast %12 : i32 to vector<256x1xi32>
    %14 = arith.remsi %10, %13 : vector<256x1xi32>
    %c0_i32_8 = arith.constant 0 : i32
    %15 = vector.broadcast %c0_i32_8 : i32 to vector<256x1xi32>
    %16 = arith.cmpi ne, %14, %15 : vector<256x1xi32>
    %c0_i32_9 = arith.constant 0 : i32
    %17 = vector.broadcast %c0_i32_9 : i32 to vector<256x1xi32>
    %18 = arith.cmpi slt, %14, %17 : vector<256x1xi32>
    %c0_i32_10 = arith.constant 0 : i32
    %19 = arith.cmpi slt, %12, %c0_i32_10 : i32
    %20 = vector.broadcast %19 : i1 to vector<256x1xi1>
    %21 = vector.broadcast %20 : vector<256x1xi1> to vector<256x1xi1>
    %22 = arith.xori %18, %21 : vector<256x1xi1>
    %23 = arith.andi %22, %16 : vector<256x1xi1>
    %24 = vector.broadcast %12 : i32 to vector<256x1xi32>
    %25 = arith.addi %14, %24 : vector<256x1xi32>
    %26 = arith.select %23, %25, %14 : vector<256x1xi1>, vector<256x1xi32>
    %cst_11 = arith.constant 0.000000e+00 : f32
    %27 = vector.broadcast %cst_11 : f32 to vector<1x128xf32>
    %28 = vector.extract_strided_slice %9 {offsets = [0, 0], sizes = [255, 128], strides = [1, 1]} : vector<256x128xf32> to vector<255x128xf32>
    %29 = tpu.concatenate %27, %28 in 0 : vector<1x128xf32>, vector<255x128xf32> -> vector<256x128xf32>
    %c0_i32_12 = arith.constant 0 : i32
    %30 = vector.broadcast %c0_i32_12 : i32 to vector<256x1xi32>
    %31 = arith.cmpi eq, %26, %30 : vector<256x1xi32>
    %cst_13 = arith.constant 0.000000e+00 : f32
    %32 = vector.shape_cast %31 : vector<256x1xi1> to vector<256x1xi1>
    %33 = vector.broadcast %32 : vector<256x1xi1> to vector<256x128xi1>
    %34 = vector.broadcast %cst_13 : f32 to vector<256x128xf32>
    %35 = arith.select %33, %34, %29 : vector<256x128xi1>, vector<256x128xf32>
    %36 = vector.extract_strided_slice %9 {offsets = [1, 0], sizes = [255, 128], strides = [1, 1]} : vector<256x128xf32> to vector<255x128xf32>
    %37 = tpu.concatenate %36, %27 in 0 : vector<255x128xf32>, vector<1x128xf32> -> vector<256x128xf32>
    %c15_i32 = arith.constant 15 : i32
    %38 = vector.broadcast %c15_i32 : i32 to vector<256x1xi32>
    %39 = arith.cmpi eq, %26, %38 : vector<256x1xi32>
    %cst_14 = arith.constant 0.000000e+00 : f32
    %40 = vector.shape_cast %39 : vector<256x1xi1> to vector<256x1xi1>
    %41 = vector.broadcast %40 : vector<256x1xi1> to vector<256x128xi1>
    %42 = vector.broadcast %cst_14 : f32 to vector<256x128xf32>
    %43 = arith.select %41, %42, %37 : vector<256x128xi1>, vector<256x128xf32>
    %44 = tpu.concatenate %35, %9, %43 in 1 : vector<256x128xf32>, vector<256x128xf32>, vector<256x128xf32> -> vector<256x384xf32>
    %45 = arith.truncf %44 : vector<256x384xf32> to vector<256x384xbf16>
    %c0_15 = arith.constant 0 : index
    %c0_16 = arith.constant 0 : index
    %46 = vector.load %arg4[%c0_15, %c0_16] : memref<384x384xbf16, #tpu.memory_space<vmem>>, vector<384x384xbf16>
    %cst_17 = arith.constant dense<0.000000e+00> : vector<256x384xf32>
    %47 = tpu.matmul %45, %46, %cst_17 {dimension_numbers = #tpu.dot_dimension_numbers<[1], [0], [0], [1], [0, 0, 1, 1], [], []>} : vector<256x384xbf16>, vector<384x384xbf16>, vector<256x384xf32> -> vector<256x384xf32>
    %48 = vector.extract_strided_slice %47 {offsets = [0, 0], sizes = [256, 128], strides = [1, 1]} : vector<256x384xf32> to vector<256x128xf32>
    %49 = vector.extract_strided_slice %47 {offsets = [0, 128], sizes = [256, 128], strides = [1, 1]} : vector<256x384xf32> to vector<256x128xf32>
    %50 = vector.extract_strided_slice %47 {offsets = [0, 256], sizes = [256, 128], strides = [1, 1]} : vector<256x384xf32> to vector<256x128xf32>
    %cst_18 = arith.constant 0.000000e+00 : f32
    %51 = vector.broadcast %cst_18 : f32 to vector<16x128xf32>
    %52 = vector.extract_strided_slice %48 {offsets = [0, 0], sizes = [240, 128], strides = [1, 1]} : vector<256x128xf32> to vector<240x128xf32>
    %53 = tpu.concatenate %51, %52 in 0 : vector<16x128xf32>, vector<240x128xf32> -> vector<256x128xf32>
    %54 = arith.addf %49, %53 : vector<256x128xf32>
    %55 = vector.extract_strided_slice %50 {offsets = [16, 0], sizes = [240, 128], strides = [1, 1]} : vector<256x128xf32> to vector<240x128xf32>
    %56 = tpu.concatenate %55, %51 in 0 : vector<240x128xf32>, vector<16x128xf32> -> vector<256x128xf32>
    %57 = arith.addf %54, %56 : vector<256x128xf32>
    %c0_19 = arith.constant 0 : index
    %c0_20 = arith.constant 0 : index
    %58 = vector.load %arg5[%c0_19, %c0_20] : memref<1x128xf32, #tpu.memory_space<vmem>>, vector<1x128xf32>
    %59 = vector.broadcast %58 : vector<1x128xf32> to vector<256x128xf32>
    %60 = arith.addf %57, %59 : vector<256x128xf32>
    %cst_21 = arith.constant 0.000000e+00 : f32
    %61 = vector.broadcast %cst_21 : f32 to vector<256x128xf32>
    %62 = arith.maximumf %60, %61 : vector<256x128xf32>
    %63 = arith.truncf %62 : vector<256x128xf32> to vector<256x128xbf16>
    %c0_22 = arith.constant 0 : index
    %c0_23 = arith.constant 0 : index
    %64 = vector.load %arg6[%c0_22, %c0_23] : memref<128x128xbf16, #tpu.memory_space<vmem>>, vector<128x128xbf16>
    %cst_24 = arith.constant dense<0.000000e+00> : vector<256x128xf32>
    %65 = tpu.matmul %63, %64, %cst_24 {dimension_numbers = #tpu.dot_dimension_numbers<[1], [0], [0], [1], [0, 0, 1, 1], [], []>} : vector<256x128xbf16>, vector<128x128xbf16>, vector<256x128xf32> -> vector<256x128xf32>
    %c0_25 = arith.constant 0 : index
    %c0_26 = arith.constant 0 : index
    %66 = vector.load %arg7[%c0_25, %c0_26] : memref<1x128xf32, #tpu.memory_space<vmem>>, vector<1x128xf32>
    %67 = vector.broadcast %66 : vector<1x128xf32> to vector<256x128xf32>
    %68 = arith.addf %65, %67 : vector<256x128xf32>
    %cst_27 = arith.constant dense<0.000000e+00> : vector<128xf32>
    %69 = vector.multi_reduction <add>, %68, %cst_27 [0] : vector<256x128xf32> to vector<128xf32>
    %70 = vector.shape_cast %69 : vector<128xf32> to vector<1x128xf32>
    %cst_28 = arith.constant 2.560000e+02 : f32
    %71 = vector.broadcast %cst_28 : f32 to vector<1x128xf32>
    %72 = arith.divf %70, %71 : vector<1x128xf32>
    %73 = arith.truncf %72 : vector<1x128xf32> to vector<1x128xbf16>
    %c0_29 = arith.constant 0 : index
    %c0_30 = arith.constant 0 : index
    %74 = vector.load %arg8[%c0_29, %c0_30] : memref<128x128xbf16, #tpu.memory_space<vmem>>, vector<128x128xbf16>
    %cst_31 = arith.constant dense<0.000000e+00> : vector<1x128xf32>
    %75 = tpu.matmul %73, %74, %cst_31 {dimension_numbers = #tpu.dot_dimension_numbers<[1], [0], [0], [1], [0, 0, 1, 1], [], []>} : vector<1x128xbf16>, vector<128x128xbf16>, vector<1x128xf32> -> vector<1x128xf32>
    %c0_32 = arith.constant 0 : index
    %c0_33 = arith.constant 0 : index
    %76 = vector.load %arg9[%c0_32, %c0_33] : memref<1x128xf32, #tpu.memory_space<vmem>>, vector<1x128xf32>
    %77 = arith.addf %75, %76 : vector<1x128xf32>
    %cst_34 = arith.constant 0.000000e+00 : f32
    %78 = vector.broadcast %cst_34 : f32 to vector<1x128xf32>
    %79 = arith.maximumf %77, %78 : vector<1x128xf32>
    %80 = arith.truncf %79 : vector<1x128xf32> to vector<1x128xbf16>
    %c0_35 = arith.constant 0 : index
    %c0_36 = arith.constant 0 : index
    %81 = vector.load %arg10[%c0_35, %c0_36] : memref<128x128xbf16, #tpu.memory_space<vmem>>, vector<128x128xbf16>
    %cst_37 = arith.constant dense<0.000000e+00> : vector<1x128xf32>
    %82 = tpu.matmul %80, %81, %cst_37 {dimension_numbers = #tpu.dot_dimension_numbers<[1], [0], [0], [1], [0, 0, 1, 1], [], []>} : vector<1x128xbf16>, vector<128x128xbf16>, vector<1x128xf32> -> vector<1x128xf32>
    %c0_38 = arith.constant 0 : index
    %c0_39 = arith.constant 0 : index
    %83 = vector.load %arg11[%c0_38, %c0_39] : memref<1x128xf32, #tpu.memory_space<vmem>>, vector<1x128xf32>
    %84 = arith.addf %82, %83 : vector<1x128xf32>
    %85 = arith.negf %84 : vector<1x128xf32>
    %86 = math.exp %85 : vector<1x128xf32>
    %cst_40 = arith.constant 1.000000e+00 : f32
    %87 = vector.broadcast %cst_40 : f32 to vector<1x128xf32>
    %88 = arith.addf %87, %86 : vector<1x128xf32>
    %89 = arith.divf %87, %88 : vector<1x128xf32>
    %90 = vector.broadcast %89 : vector<1x128xf32> to vector<256x128xf32>
    %91 = arith.mulf %68, %90 : vector<256x128xf32>
    %92 = arith.extf %2 : vector<256x128xbf16> to vector<256x128xf32>
    %93 = arith.addf %91, %92 : vector<256x128xf32>
    %cst_41 = arith.constant 0.000000e+00 : f32
    %94 = vector.broadcast %cst_41 : f32 to vector<256x128xf32>
    %95 = arith.maximumf %93, %94 : vector<256x128xf32>
    %96 = vector.shape_cast %95 : vector<256x128xf32> to vector<16x16x128xf32>
    %97 = vector.extract_strided_slice %96 {offsets = [0, 0, 0], sizes = [16, 16, 64], strides = [1, 1, 1]} : vector<16x16x128xf32> to vector<16x16x64xf32>
    %c0_42 = arith.constant 0 : index
    %c0_43 = arith.constant 0 : index
    %c0_44 = arith.constant 0 : index
    %c0_45 = arith.constant 0 : index
    %98 = vector.load %arg12[%c0_42, %c0_43, %c0_44, %c0_45] : memref<1x16x16x64xf32, #tpu.memory_space<vmem>>, vector<1x16x16x64xf32>
    %99 = vector.shape_cast %98 : vector<1x16x16x64xf32> to vector<16x16x64xf32>
    %100 = vector.shape_cast %97 : vector<16x16x64xf32> to vector<1x16x16x64xf32>
    tpu.vector_store %arg12[%c0_42, %c0_43, %c0_44, %c0_45], %100 {strides = array<i32>} : memref<1x16x16x64xf32, #tpu.memory_space<vmem>>, vector<1x16x16x64xf32>,
    return
  }
  func.func @transform_0(%arg0: i32) -> (i32, i32, i32, i32) {
    %c0_i32 = arith.constant 0 : i32
    %c0_i32_0 = arith.constant 0 : i32
    %c0_i32_1 = arith.constant 0 : i32
    %c0_i32_2 = arith.constant 0 : i32
    return %arg0, %c0_i32, %c0_i32_0, %c0_i32_1 : i32, i32, i32, i32
  }
  func.func @transform_1(%arg0: i32) -> (i32, i32) {
    %c0_i32 = arith.constant 0 : i32
    %c0_i32_0 = arith.constant 0 : i32
    %c0_i32_1 = arith.constant 0 : i32
    return %c0_i32, %c0_i32_0 : i32, i32
  }
  func.func @transform_2(%arg0: i32) -> (i32, i32) {
    %c0_i32 = arith.constant 0 : i32
    %c0_i32_0 = arith.constant 0 : i32
    %c0_i32_1 = arith.constant 0 : i32
    return %c0_i32, %c0_i32_0 : i32, i32
  }
  func.func @transform_3(%arg0: i32) -> (i32, i32) {
    %c0_i32 = arith.constant 0 : i32
    %c0_i32_0 = arith.constant 0 : i32
    %c0_i32_1 = arith.constant 0 : i32
    return %c0_i32, %c0_i32_0 : i32, i32
  }
  func.func @transform_4(%arg0: i32) -> (i32, i32) {
    %c0_i32 = arith.constant 0 : i32
    %c0_i32_0 = arith.constant 0 : i32
    %c0_i32_1 = arith.constant 0 : i32
    return %c0_i32, %c0_i32_0 : i32, i32
  }
  func.func @transform_5(%arg0: i32) -> (i32, i32) {
    %c0_i32 = arith.constant 0 : i32
    %c0_i32_0 = arith.constant 0 : i32
    %c0_i32_1 = arith.constant 0 : i32
    return %c0_i32, %c0_i32_0 : i32, i32
  }
  func.func @transform_6(%arg0: i32) -> (i32, i32) {
    %c0_i32 = arith.constant 0 : i32
    %c0_i32_0 = arith.constant 0 : i32
    %c0_i32_1 = arith.constant 0 : i32
    return %c0_i32, %c0_i32_0 : i32, i32
  }
  func.func @transform_7(%arg0: i32) -> (i32, i32) {
    %c0_i32 = arith.constant 0 : i32
    %c0_i32_0 = arith.constant 0 : i32
    %c0_i32_1 = arith.constant 0 : i32
    return %c0_i32, %c0_i32_0 : i32, i32
  }
  func.func @transform_8(%arg0: i32) -> (i32, i32) {
    %c0_i32 = arith.constant 0 : i32
    %c0_i32_0 = arith.constant 0 : i32
    %c0_i32_1 = arith.constant 0 : i32
    return %c0_i32, %c0_i32_0 : i32, i32
  }
  func.func @transform_9(%arg0: i32) -> (i32, i32) {
    %c0_i32 = arith.constant 0 : i32
    %c0_i32_0 = arith.constant 0 : i32
    %c0_i32_1 = arith.constant 0 : i32
    return %c0_i32, %c0_i32_0 : i32, i32
  }
  func.func @transform_10(%arg0: i32) -> (i32, i32) {
    %c0_i32 = arith.constant 0 : i32
    %c0_i32_0 = arith.constant 0 : i32
    %c0_i32_1 = arith.constant 0 : i32
    return %c0_i32, %c0_i32_0 : i32, i32
  }
  func.func @transform_11(%arg0: i32) -> (i32, i32, i32, i32) {
    %c0_i32 = arith.constant 0 : i32
    %c0_i32_0 = arith.constant 0 : i32
    %c0_i32_1 = arith.constant 0 : i32
    %c0_i32_2 = arith.constant 0 : i32
    return %arg0, %c0_i32, %c0_i32_0, %c0_i32_1 : i32, i32, i32, i32
  }
}

</mosaic_0001>

<bundles_post_ra>
// kernel: se_bottleneck.1
= control target key start
LH: loop header
LB: loop body
LE: loop exit
PB: predicated region body
PF: predicated region fallthrough
CT: control target
= control target key end

     0   :  { %s6840_s0 = inlined_call_operand.vmem [shape: bf16[2,16,16,128], index: 0, kind: input, shape index: {}]   ;;  %s6841_s1 = inlined_call_operand.vmem [shape: bf16[128,128], index: 1, kind: input, shape index: {}]   ;;  %s6842_s2 = inlined_call_operand.vmem [shape: f32[1,128], index: 2, kind: input, shape index: {}]   ;;  %s6843_s3 = inlined_call_operand.vmem [shape: bf16[384,384], index: 3, kind: input, shape index: {}]   ;;  %s6844_s4 = inlined_call_operand.vmem [shape: f32[1,128], index: 4, kind: input, shape index: {}]   ;;  %s6845_s5 = inlined_call_operand.vmem [shape: bf16[128,128], index: 5, kind: input, shape index: {}]   ;;  %s6846_s6 = inlined_call_operand.vmem [shape: f32[1,128], index: 6, kind: input, shape index: {}]   ;;  %s6847_s7 = inlined_call_operand.vmem [shape: bf16[128,128], index: 7, kind: input, shape index: {}]   ;;  %s6848_s8 = inlined_call_operand.vmem [shape: f32[1,128], index: 8, kind: input, shape index: {}]   ;;  %s6849_s9 = inlined_call_operand.vmem [shape: bf16[128,128], index: 9, kind: input, shape index: {}]   ;;  %s6850_s10 = inlined_call_operand.vmem [shape: f32[1,128], index: 10, kind: input, shape index: {}]   ;;  %s6851_s11 = inlined_call_operand.hbm [shape: f32[2,16,16,64], index: 11, kind: output, shape index: {}]  }
   0x1   :  { %6852 = sst [smem:[#allocation5_spill]] %s6840_s0 }
   0x2   :  { %16 = vsyncpa [#allocation3], 0 }
   0x3   :  { %18 = vsyncpa [#allocation3 + $0x1], 0  ;;  %s5019_s17 = smov 0   ;;  %s5021_s18 = smov 0  }
   0x4   :  { %s5023_s19 = smov 0   ;;  %s5025_s20 = smov 0  }
   0x5 LB: > { %s5040_s21 = sadd.s32 4294967295, %s4950_s20   ;;  %s3787_s22 = sadd.s32 4294967294, %s4950_s20   ;;  %s4950_s20 = sphi %s5025_s20, %s6946_s20   ;;  %s4946_s19 = sphi %s5023_s19, %s6945_s19   ;;  %s4942_s18 = sphi %s5021_s18, %s6944_s18   ;;  %s4938_s17 = sphi %s5019_s17, %s6943_s17  }
   0x6   : > { %s5044_s23 = sadd.s32 1, %s4950_s20   ;;  %s267_s24 = sadd.s32 1, %s4946_s19 }
   0x7   : > { %s264_s25 = ssub.s32 %s4950_s20, %s5044_s23  ;;  %p277_p0 = scmp.ne.s32.totalorder %s4946_s19, %s4942_s18 }
   0x8   : > { %p265_p1 = scmp.eq.s32.totalorder %s264_s25, 0  ;;  %p278_p2 = scmp.eq.s32.totalorder %s5040_s21, 1 }
   0x9   : > { %p283_p3 = scmp.ne.s32.totalorder %s4942_s18, %s4938_s17  ;;  %p284_p4 = scmp.eq.s32.totalorder %s3787_s22, 1 }
   0xa   : > { %s5055_s26 = scalar_select %p265_p1, %s4946_s19, %s267_s24  }
   0xb   : > { %p5057_p5 = por %p278_p2, %p277_p0  ;;  %p5061_p6 = por %p284_p4, %p283_p3 }
   0xc   : > { %p3790_p7 = scmp.ge.s32.totalorder %s4950_s20, 1  ;;  %p340_p8 = scmp.lt.s32.totalorder %s4950_s20, 3 }
   0xe   : > { %p341_p9 = pnand %p3790_p7, %p340_p8 }
   0xf   : > { %v4708_v0 = vld [vmem:[%s6841_s1] sm:$0xff] (!%p341_p9)   ;;  %p380_p10 = scmp.lt.s32.totalorder (!%p341_p9), %s5040_s21, 1  ;;  %v4709_v1 = vld [vmem:[%s6841_s1 + $0x8] sm:$0xff] (!%p341_p9)   ;;  %v4710_v2 = vld [vmem:[%s6841_s1 + $0x10] sm:$0xff] (!%p341_p9)   ;;  %s6855_s0 = sld [smem:[#allocation5_spill]] (!%p341_p9)  ;;  %vm1227_vm0 = vcmask (!%p341_p9), 1040384  }
  0x10   : > { %344 = sbr.rel (%p341_p9) target bundleno = 1496 (0x5d8), region = 64  ;;  %4415 = vmatprep.subr.bf16.mxu0 (!%p341_p9), %v4708_v0  ;;  %v4711_v3 = vld [vmem:[%s6841_s1 + $0x18] sm:$0xff] (!%p341_p9)   ;;  %v4712_v5 = vld [vmem:[%s6841_s1 + $0x20] sm:$0xff] (!%p341_p9)   ;;  %v4713_v9 = vld [vmem:[%s6841_s1 + $0x28] sm:$0xff] (!%p341_p9)   ;;  %vm1452_vm1 = vcmask (!%p341_p9), 1046528   ;;  %vm4952_vm3 = vmmov (!%p341_p9), 1  }
  0x11   : > { %4416 = vmatpush3.bf16.msra.mxu0 (!%p341_p9), %v4708_v0  ;;  %v4732_v6 = vld [vmem:[%s6843_s3 + $0x4] ss:$12 sps:$4 sm:$0xff] (!%p341_p9)   ;;  %v4734_v7 = vld [vmem:[%s6843_s3] ss:$12 sps:$4 sm:$0xff] (!%p341_p9)   ;;  %v4735_v8 = vld [vmem:[%s6843_s3 + $0x1c] ss:$12 sps:$4 sm:$0xff] (!%p341_p9)  }
  0x12   : > { %4417 = vmatprep.subr.bf16.mxu0 (!%p341_p9), %v4709_v1  ;;  %2205 = vmatprep.subr.bf16.mxu1 (!%p341_p9), %v4732_v6  ;;  %v4737_v10 = vld [vmem:[%s6843_s3 + $0x18] ss:$12 sps:$4 sm:$0xff] (!%p341_p9)   ;;  %v4738_v11 = vld [vmem:[%s6843_s3 + $0x34] ss:$12 sps:$4 sm:$0xff] (!%p341_p9)   ;;  %v4740_v13 = vld [vmem:[%s6843_s3 + $0x30] ss:$12 sps:$4 sm:$0xff] (!%p341_p9)  }
  0x13   : > { %2206 = vmatpush1.bf16.msra.mxu1 (!%p341_p9), %v4734_v7  ;;  %v4714_v12 = vld [vmem:[%s6841_s1 + $0x30] sm:$0xff] (!%p341_p9)   ;;  %v4741_v14 = vld [vmem:[%s6843_s3 + $0x4c] ss:$12 sps:$4 sm:$0xff] (!%p341_p9)   ;;  %v4747_v22 = vld [vmem:[%s6843_s3 + $0x7c] ss:$12 sps:$4 sm:$0xff] (!%p341_p9)   ;;  %s4956_s30 = smov (!%p341_p9), [#allocation2]  }
  0x14   : > { %2207 = vmatprep.subr.bf16.mxu1 (!%p341_p9), %v4735_v8  ;;  %v4715_v15 = vld [vmem:[%s6841_s1 + $0x38] sm:$0xff] (!%p341_p9)   ;;  %v4743_v16 = vld [vmem:[%s6843_s3 + $0x48] ss:$12 sps:$4 sm:$0xff] (!%p341_p9)   ;;  %v4744_v17 = vld [vmem:[%s6843_s3 + $0x64] ss:$12 sps:$4 sm:$0xff] (!%p341_p9)   ;;  %s4892_s12 = sshll.u32 (!%p341_p9), %s4956_s30, 4  ;;  %s4893_s12 = int_to_ptr.vmem [resolvable:$false] %s4892_s12 }
  0x15   : > { %4418 = vmatpush3.bf16.msra.mxu0 (!%p341_p9), %v4709_v1  ;;  %v4759_v20 = vld [vmem:[%s6843_s3 + $0xc8] ss:$12 sps:$4 sm:$0xff] (!%p341_p9)   ;;  %v4746_v21 = vld [vmem:[%s6843_s3 + $0x60] ss:$12 sps:$4 sm:$0xff] (!%p341_p9)   ;;  %v4749_v26 = vld [vmem:[%s6843_s3 + $0x78] ss:$12 sps:$4 sm:$0xff] (!%p341_p9)  }
  0x16   : > { %4419 = vmatprep.subr.bf16.mxu0 (!%p341_p9), %v4710_v2  ;;  %v4760_v23 = vld [vmem:[%s6843_s3 + $0x8] ss:$12 sps:$4 sm:$0xff] (!%p341_p9)   ;;  %v4764_v24 = vld [vmem:[%s6843_s3 + $0xe0] ss:$12 sps:$4 sm:$0xff] (!%p341_p9)   ;;  %v4769_v30 = vld [vmem:[%s6843_s3 + $0xf8] ss:$12 sps:$4 sm:$0xff] (!%p341_p9)  }
  0x17   : > { %s381_s14 = scalar_select %p380_p10, %s5040_s21, 1  ;;  %2208 = vmatpush1.bf16.msra.mxu1 %v4737_v10  ;;  %v4750_v28 = vld [vmem:[%s6843_s3 + $0x94] ss:$12 sps:$4 sm:$0xff]   ;;  %v4752_v31 = vld [vmem:[%s6843_s3 + $0x90] ss:$12 sps:$4 sm:$0xff]   ;;  %v778_v10 = vlaneseq }
  0x18   : > { %2209 = vmatprep.subr.bf16.mxu1 %v4738_v11  ;;  %v4765_v29 = vld [vmem:[%s6843_s3 + $0x20] ss:$12 sps:$4 sm:$0xff]   ;;  %v4755_v33 = vld [vmem:[%s6843_s3 + $0xa8] ss:$12 sps:$4 sm:$0xff]   ;;  %v4770_v34 = vld [vmem:[%s6843_s3 + $0x38] ss:$12 sps:$4 sm:$0xff]  }
  0x19   : > { %s4179_s22 = sshll.u32 %s381_s14, 7  ;;  %4420 = vmatpush3.bf16.msra.mxu0 %v4710_v2  ;;  %v4753_v32 = vld [vmem:[%s6843_s3 + $0xac] ss:$12 sps:$4 sm:$0xff]   ;;  %v4756_v35 = vld [vmem:[%s6843_s3 + $0xc4] ss:$12 sps:$4 sm:$0xff]   ;;  %v5267_v11 = vshrl.u32 %v778_v10, 7 }
  0x1a   : > { %s5081_s29 = scalar_lea.vmem %s6855_s0, %s4179_s22  ;;  %4421 = vmatprep.subr.bf16.mxu0 %v4711_v3  ;;  %v4774_v36 = vld [vmem:[%s6843_s3 + $0x110] ss:$12 sps:$4 sm:$0xff]   ;;  %v4779_v40 = vld [vmem:[%s6843_s3 + $0x128] ss:$12 sps:$4 sm:$0xff]   ;;  %v4758_v41 = vld [vmem:[%s6843_s3 + $0xc0] ss:$12 sps:$4 sm:$0xff]  }
  0x1b   : > { %v386_v4 = vld [vmem:[%s5081_s29] sm:$0xff]   ;;  %2210 = vmatpush1.bf16.msra.mxu1 %v4740_v13  ;;  %v388_v18 = vld [vmem:[%s5081_s29 + $0x8] sm:$0xff]   ;;  %v390_v19 = vld [vmem:[%s5081_s29 + $0x10] sm:$0xff]   ;;  %s4180_s14 = sshll.u32 %s5040_s21, 12 }
  0x1c   : > { %4431 = vmatprep.mubr.bf16.mxu0 %v386_v4  ;;  %2211 = vmatprep.subr.bf16.mxu1 %v4741_v14  ;;  %v392_v25 = vld [vmem:[%s5081_s29 + $0x18] sm:$0xff]   ;;  %v394_v27 = vld [vmem:[%s5081_s29 + $0x20] sm:$0xff]   ;;  %v396_v37 = vld [vmem:[%s5081_s29 + $0x28] sm:$0xff]   ;;  %s6765_s24 = scalar_lea.hbm %s6851_s11, %s4180_s14 }
  0x1d   : > { %4422 = vmatpush3.bf16.msra.mxu0 %v4711_v3  ;;  %v4775_v38 = vld [vmem:[%s6843_s3 + $0x50] ss:$12 sps:$4 sm:$0xff]   ;;  %v4780_v43 = vld [vmem:[%s6843_s3 + $0x68] ss:$12 sps:$4 sm:$0xff]   ;;  %v4763_v44 = vld [vmem:[%s6843_s3 + $0xd8] ss:$12 sps:$4 sm:$0xff]  }
  0x1e   : > { %4423 = vmatprep.subr.bf16.mxu0 %v4712_v5  ;;  %v398_v39 = vld [vmem:[%s5081_s29 + $0x30] sm:$0xff]   ;;  %v4761_v42 = vld [vmem:[%s6843_s3 + $0xdc] ss:$12 sps:$4 sm:$0xff]   ;;  %v402_v47 = vld [vmem:[%s5081_s29 + $0x40] sm:$0xff]  }
  0x1f   : > { %2212 = vmatpush1.bf16.msra.mxu1 %v4743_v16  ;;  %v4766_v45 = vld [vmem:[%s6843_s3 + $0xf4] ss:$12 sps:$4 sm:$0xff]   ;;  %v400_v46 = vld [vmem:[%s5081_s29 + $0x38] sm:$0xff]   ;;  %v4776_v51 = vld [vmem:[%s6843_s3 + $0x124] ss:$12 sps:$4 sm:$0xff]   ;;  %v815_v16 = vand.u32 15, %v5267_v11 }
  0x20   : > { %2213 = vmatprep.subr.bf16.mxu1 %v4744_v17  ;;  %v4768_v48 = vld [vmem:[%s6843_s3 + $0xf0] ss:$12 sps:$4 sm:$0xff]   ;;  %v4771_v49 = vld [vmem:[%s6843_s3 + $0x10c] ss:$12 sps:$4 sm:$0xff]   ;;  %v4773_v50 = vld [vmem:[%s6843_s3 + $0x108] ss:$12 sps:$4 sm:$0xff]  }
  0x21   : > { %4424 = vmatpush3.bf16.msra.mxu0 %v4712_v5  ;;  %v404_v52 = vld [vmem:[%s5081_s29 + $0x48] sm:$0xff]   ;;  %v406_v53 = vld [vmem:[%s5081_s29 + $0x50] sm:$0xff]   ;;  %v408_v55 = vld [vmem:[%s5081_s29 + $0x58] sm:$0xff]   ;;  %vm5282_vm2 = vcmp.ne.s32.totalorder %v815_v16, 0 }
  0x22   : > { %4425 = vmatprep.subr.bf16.mxu0 %v4713_v9  ;;  %v4778_v54 = vld [vmem:[%s6843_s3 + $0x120] ss:$12 sps:$4 sm:$0xff]   ;;  %v414_v58 = vld [vmem:[%s5081_s29 + $0x70] sm:$0xff]   ;;  %v416_v59 = vld [vmem:[%s5081_s29 + $0x78] sm:$0xff]  }
  0x23   : > { %2214 = vmatpush1.bf16.msra.mxu1 %v4746_v21  ;;  %v410_v56 = vld [vmem:[%s5081_s29 + $0x60] sm:$0xff]   ;;  %v412_v57 = vld [vmem:[%s5081_s29 + $0x68] sm:$0xff]   ;;  %v4788_v2 = vld [vmem:[%s6843_s3 + $0x150] ss:$12 sps:$4 sm:$0xff]  }
  0x24   : > { %2215 = vmatprep.subr.bf16.mxu1 %v4747_v22  ;;  %v4781_v60 = vld [vmem:[%s6843_s3 + $0x13c] ss:$12 sps:$4 sm:$0xff]   ;;  %v4784_v61 = vld [vmem:[%s6843_s3 + $0x140] ss:$12 sps:$4 sm:$0xff]   ;;  %v4783_v62 = vld [vmem:[%s6843_s3 + $0x138] ss:$12 sps:$4 sm:$0xff]  }
  0x25   : > { %4426 = vmatpush3.bf16.msra.mxu0 %v4713_v9  ;;  %v4785_v63 = vld [vmem:[%s6843_s3 + $0x80] ss:$12 sps:$4 sm:$0xff]   ;;  %v4789_v1 = vld [vmem:[%s6843_s3 + $0x158] ss:$12 sps:$4 sm:$0xff]   ;;  %v4794_v5 = vld [vmem:[%s6843_s3 + $0x170] ss:$12 sps:$4 sm:$0xff]  }
  0x26   : > { %4427 = vmatprep.subr.bf16.mxu0 %v4714_v12  ;;  %v4786_v0 = vld [vmem:[%s6843_s3 + $0x154] ss:$12 sps:$4 sm:$0xff]   ;;  %v4790_v3 = vld [vmem:[%s6843_s3 + $0x98] ss:$12 sps:$4 sm:$0xff]   ;;  %v4795_v7 = vld [vmem:[%s6843_s3 + $0xb0] ss:$12 sps:$4 sm:$0xff]  }
  0x27   : > { %2216 = vmatpush1.bf16.msra.mxu1 %v4749_v26  ;;  %v4791_v4 = vld [vmem:[%s6843_s3 + $0x16c] ss:$12 sps:$4 sm:$0xff]   ;;  %v4793_v6 = vld [vmem:[%s6843_s3 + $0x168] ss:$12 sps:$4 sm:$0xff]   ;;  %v4798_v8 = vld [vmem:[%s6843_s3 + $0x184] ss:$12 sps:$4 sm:$0xff]  }
  0x28   : > { %2217 = vmatprep.subr.bf16.mxu1 %v4750_v28  ;;  %v5264_v9 = vld [vmem:[%s6843_s3 + $0x188] ss:$12 sps:$4 sm:$0xff]   ;;  %vm3892_vm4 = vmpackc.low %vm4952_vm3, %vm5282_vm2 }
  0x29   : > { %4428 = vmatpush3.bf16.msra.mxu0 %v4714_v12  ;;  %v5272_v12 = vld [vmem:[%s6842_s2] ss:$0 sm:$0xff] }
  0x2a   : > { %4429 = vmatprep.subr.bf16.mxu0 %v4715_v15 }
  0x2b   : > { %2218 = vmatpush1.bf16.msra.mxu1 %v4752_v31 }
  0x2c   : > { %2219 = vmatprep.subr.bf16.mxu1 %v4753_v32 }
  0x2d   : > { %4430 = vmatpush3.bf16.msra.mxu0 %v4715_v15 }
  0x2e   : > { %4237 = vmatprep.subr.bf16.mxu0 %v4759_v20 }
  0x2f   : > { %2220 = vmatpush1.bf16.msra.mxu1 %v4755_v33 }
  0x30   : > { %4432 = vmatmul.mubr.bf16.vlgmr.msra.gmra.mrb[0].mxu0 %v388_v18  ;;  %2221 = vmatprep.subr.bf16.mxu1 %v4756_v35 }
  0x31   : > { %4435 = vmatprep.mubr.bf16.mxu0 %v390_v19  ;;  %4238 = vmatpush3.bf16.msra.mxu0 %v4760_v23  ;;  %v781_v19 = vadd.s32 16, %v5267_v11 }
  0x32   : > { %4239 = vmatprep.subr.bf16.mxu0 %v4764_v24 }
  0x33   : > { %2222 = vmatpush1.bf16.msra.mxu1 %v4758_v41 }
  0x34   : > { %2223 = vmatprep.subr.bf16.mxu1 %v4761_v42 }
  0x35   : > { %4240 = vmatpush3.bf16.msra.mxu0 %v4765_v29 }
  0x36   : > { %4241 = vmatprep.subr.bf16.mxu0 %v4769_v30  ;;  %v829_v30 = vand.u32 15, %v781_v19 }
  0x37   : > { %2224 = vmatpush1.bf16.msra.mxu1 %v4763_v44 }
  0x38   : > { %4436 = vmatmul.mubr.bf16.gmra.mrb[4].mxu0 %v392_v25  ;;  %2225 = vmatprep.subr.bf16.mxu1 %v4766_v45  ;;  %vm5326_vm5 = vcmp.ne.s32.totalorder %v829_v30, 0 }
  0x39   : > { %4439 = vmatprep.mubr.bf16.mxu0 %v394_v27  ;;  %4242 = vmatpush3.bf16.msra.mxu0 %v4770_v34  ;;  %vm5358_vm6 = vmpackc.low %vm4952_vm3, %vm5326_vm5 }
  0x3a   : > { %4243 = vmatprep.subr.bf16.mxu0 %v4774_v36 }
  0x3b   : > { %2226 = vmatpush1.bf16.msra.mxu1 %v4768_v48  ;;  %v4796_v48 = vld [vmem:[%s6843_s3 + $0x180] ss:$12 sps:$4 sm:$0xff]  }
  0x3c   : > { %2227 = vmatprep.subr.bf16.mxu1 %v4771_v49 }
  0x3d   : > { %4244 = vmatpush3.bf16.msra.mxu0 %v4775_v38 }
  0x3e   : > { %4245 = vmatprep.subr.bf16.mxu0 %v4779_v40 }
  0x3f   : > { %2228 = vmatpush1.bf16.msra.mxu1 %v4773_v50 }
  0x40   : > { %4440 = vmatmul.mubr.bf16.gmra.mrb[8].mxu0 %v396_v37  ;;  %2229 = vmatprep.subr.bf16.mxu1 %v4776_v51 }
  0x41   : > { %4443 = vmatprep.mubr.bf16.mxu0 %v398_v39  ;;  %4246 = vmatpush3.bf16.msra.mxu0 %v4780_v43  ;;  %v5290_v39 = vadd.s32 32, %v5267_v11 }
  0x42   : > { %4247 = vmatprep.subr.bf16.mxu0 %v4784_v61 }
  0x43   : > { %2230 = vmatpush1.bf16.msra.mxu1 %v4778_v54 }
  0x44   : > { %2231 = vmatprep.subr.bf16.mxu1 %v4781_v60 }
  0x45   : > { %4248 = vmatpush3.bf16.msra.mxu0 %v4785_v63  ;;  %v4812_v63 = vld [vmem:[%s6843_s3 + $0x1a0] ss:$12 sps:$4 sm:$0xff]  }
  0x46   : > { %4249 = vmatprep.subr.bf16.mxu0 %v4789_v1 }
  0x47   : > { %2232 = vmatpush1.bf16.msra.mxu1 %v4783_v62 }
  0x48   : > { %4444 = vmatmul.mubr.bf16.gmra.mrb[12].mxu0 %v400_v46  ;;  %2233 = vmatprep.subr.bf16.mxu1 %v4786_v0 }
  0x49   : > { %4447 = vmatprep.mubr.bf16.mxu0 %v402_v47  ;;  %4250 = vmatpush3.bf16.msra.mxu0 %v4790_v3 }
  0x4a   : > { %4251 = vmatprep.subr.bf16.mxu0 %v4794_v5  ;;  %v4799_v5 = vld [vmem:[%s6843_s3 + $0x198] ss:$12 sps:$4 sm:$0xff]  }
  0x4b   : > { %2234 = vmatpush1.bf16.msra.mxu1 %v4788_v2 }
  0x4c   : > { %2235 = vmatprep.subr.bf16.mxu1 %v4791_v4 }
  0x4d   : > { %4252 = vmatpush3.bf16.msra.mxu0 %v4795_v7 }
  0x4e   : > { %4463 = vmatprep.subr.bf16.mxu0 %v5264_v9 }
  0x4f   : > { %2236 = vmatpush1.bf16.msra.mxu1 %v4793_v6 }
  0x50   : > { %4448 = vmatmul.mubr.bf16.gmra.mrb[16].mxu0 %v404_v52  ;;  %2396 = vmatprep.subr.bf16.mxu1 %v4798_v8  ;;  %v843_v8 = vand.u32 15, %v5290_v39 }
  0x51   : > { %4451 = vmatprep.mubr.bf16.mxu0 %v406_v53 }
  0x52   : > { %vm5410_vm7 = vcmp.ne.s32.totalorder %v843_v8, 0 }
  0x53   : > { %vm5447_vm8 = vmpackc.low %vm4952_vm3, %vm5410_vm7 }
  0x58   : > { %4452 = vmatmul.mubr.bf16.gmra.mrb[20].mxu0 %v408_v55 }
  0x59   : > { %4455 = vmatprep.mubr.bf16.mxu0 %v410_v56  ;;  %v4801_v56 = vld [vmem:[%s6843_s3 + $0x19c] ss:$12 sps:$4 sm:$0xff]  }
  0x60   : > { %4456 = vmatmul.mubr.bf16.gmra.mrb[24].mxu0 %v412_v57 }
  0x61   : > { %4459 = vmatprep.mubr.bf16.mxu0 %v414_v58 }
  0x68   : > { %4460 = vmatmul.mubr.bf16.gmra.mrb[28].mxu0 %v416_v59 }
 0x103   : > { %v4433_v13 = vpop.f32.mrb[0].mxu0 }
 0x104   : > { %v628_v14 = vadd.f32 %v4433_v13, %v5272_v12  ;;  %v619_v15 = vpop.f32.mrb[1].mxu0  ;;  %v4804_v13 = vld [vmem:[%s6843_s3 + $0x1b4] ss:$12 sps:$4 sm:$0xff]  }
 0x105   : > { %v620_v17 = vadd.f32 %v5272_v12, %v619_v15  ;;  %v4434_v18 = vpop.f32.mrb[2].mxu0 }
 0x106   : > { %v748_v20 = vmax.f32 %v628_v14, 0.0  ;;  %v631_v21 = vadd.f32 %v4434_v18, %v5272_v12  ;;  %v622_v22 = vpop.f32.mrb[3].mxu0 }
 0x107   : > { %v746_v23 = vmax.f32 %v620_v17, 0.0  ;;  %v623_v24 = vadd.f32 %v5272_v12, %v622_v22 }
 0x108   : > { %v5280_v25 = vmax.f32 %v631_v21, 0.0  ;;  %v1231_v27 = vrot.slane %v748_v20, 7  ;;  %v1456_v31 = vrot.slane %v748_v20, 1 }
 0x109   : > { %v1228_v28 = vrot.slane %v746_v23, 7  ;;  %v747_v29 = vmax.f32 %v623_v24, 0.0  ;;  %v1453_v40 = vrot.slane %v746_v23, 1 }
 0x10a   : > { %v1233_v32 = vrot.slane %v5280_v25, 7  ;;  %v1458_v33 = vrot.slane %v5280_v25, 1  ;;  %v1681_v34 = vpack.c.bf16 %v5280_v25, %v748_v20  ;;  %v5364_v25 = vadd.s32 48, %v5267_v11 }
 0x10b   : > { %v1229_v35 = vrot.slane %v747_v29, 7  ;;  %v1454_v36 = vrot.slane %v747_v29, 1  ;;  %v4437_v37 = vpop.f32.mrb[4].mxu0  ;;  %v1678_v38 = vpack.c.bf16 %v747_v29, %v746_v23  ;;  %v1323_v45 = vsel %vm1227_vm0, 0.0, %v1228_v28 }
 0x10c   : > { %v1459_v41 = vsel %vm1452_vm1, %v1456_v31, %v1458_v33  ;;  %v644_v42 = vadd.f32 %v4437_v37, %v5272_v12  ;;  %v635_v43 = vpop.f32.mrb[5].mxu0  ;;  %v1234_v44 = vsel %vm1227_vm0, %v1231_v27, %v1233_v32 }
 0x10d   : > { %v636_v46 = vadd.f32 %v5272_v12, %v635_v43  ;;  %v4438_v47 = vpop.f32.mrb[6].mxu0  ;;  %2237 = vmatprep.mubr.bf16.mxu1 %v1678_v38  ;;  %2619 = vmatprep.mubr.bf16.mxu0 %v1678_v38  ;;  %v1230_v49 = vsel %vm1227_vm0, %v1228_v28, %v1229_v35  ;;  %v1232_v50 = vsel %vm1227_vm0, %v1229_v35, %v1231_v27  ;;  %v4816_v35 = vld [vmem:[%s6843_s3 + $0x1b8] ss:$12 sps:$4 sm:$0xff]  }
 0x10e   : > { %v5307_v51 = vmax.f32 %v644_v42, 0.0  ;;  %v647_v52 = vadd.f32 %v4438_v47, %v5272_v12  ;;  %v638_v53 = vpop.f32.mrb[7].mxu0  ;;  %v3893_v54 = vpack.c.bf16 %v1230_v49, %v1323_v45  ;;  %v5310_v55 = vpack.c.bf16 %v1234_v44, %v1232_v50  ;;  %v4807_v38 = vld [vmem:[%s6843_s3 + $0x1cc] ss:$12 sps:$4 sm:$0xff]   ;;  %v4820_v44 = vld [vmem:[%s6843_s3 + $0x1d0] ss:$12 sps:$4 sm:$0xff]  }
 0x10f   : > { %v750_v57 = vmax.f32 %v636_v46, 0.0  ;;  %v639_v58 = vadd.f32 %v5272_v12, %v638_v53  ;;  %v1455_v59 = vsel %vm1452_vm1, %v1453_v40, %v1454_v36  ;;  %v1457_v60 = vsel %vm1452_vm1, %v1454_v36, %v1456_v31 }
 0x110   : > { %v1239_v61 = vrot.slane %v5307_v51, 7  ;;  %v5319_v62 = vmax.f32 %v647_v52, 0.0  ;;  %3894 = vmatmul.mubr.msk.bf16.vlgmr.msra.gmra.mrb[0].mxu1 %vm3892_vm4, %v3893_v54  ;;  %4022 = vmatmul.mubr.msk.bf16.vlgmr.msra.gmra.mrb[32].mxu0 %vm3892_vm4, %v3893_v54  ;;  %v5324_v0 = vpack.c.bf16 %v1457_v60, %v1455_v59  ;;  %v1464_v6 = vrot.slane %v5307_v51, 1  ;;  %v4805_v54 = vld [vmem:[%s6843_s3 + $0x1c8] ss:$12 sps:$4 sm:$0xff]  }
 0x111   : > { %v1235_v1 = vrot.slane %v750_v57, 7  ;;  %v1460_v2 = vrot.slane %v750_v57, 1  ;;  %v751_v3 = vmax.f32 %v639_v58, 0.0  ;;  %2397 = vmatpush1.bf16.msra.mxu1 %v4796_v48  ;;  %2247 = vmatprep.mubr.bf16.mxu1 %v1681_v34  ;;  %v857_v52 = vand.u32 15, %v5364_v25  ;;  %v4811_v60 = vld [vmem:[%s6843_s3 + $0x1e4] ss:$12 sps:$4 sm:$0xff]  }
 0x112   : > { %v1241_v7 = vrot.slane %v5319_v62, 7  ;;  %2625 = vmatprep.mubr.bf16.mxu0 %v1681_v34  ;;  %2398 = vmatprep.subr.bf16.mxu1 %v4801_v56  ;;  %v5338_v10 = vpack.c.bf16 %v5319_v62, %v5307_v51  ;;  %v4802_v34 = vld [vmem:[%s6843_s3 + $0x1b0] ss:$12 sps:$4 sm:$0xff]   ;;  %v5428_v58 = vadd.s32 64, %v5267_v11 }
 0x113   : > { %v1461_v14 = vsel %vm1452_vm1, %v1458_v33, %v1460_v2  ;;  %v1237_v15 = vrot.slane %v751_v3, 7  ;;  %v1462_v16 = vrot.slane %v751_v3, 1  ;;  %v4441_v17 = vpop.f32.mrb[8].mxu0  ;;  %v1684_v18 = vpack.c.bf16 %v751_v3, %v750_v57  ;;  %4464 = vmatpush3.bf16.msra.mxu0 %v5264_v9  ;;  %v4823_v3 = vld [vmem:[%s6843_s3 + $0x22c] ss:$12 sps:$4 sm:$0xff]  }
 0x114   : > { %v5345_v19 = vpack.c.bf16 %v1461_v14, %v1459_v41  ;;  %v660_v20 = vadd.f32 %v4441_v17, %v5272_v12  ;;  %v651_v21 = vpop.f32.mrb[9].mxu0  ;;  %v1236_v22 = vsel %vm1227_vm0, %v1233_v32, %v1235_v1  ;;  %v1242_v23 = vsel %vm1227_vm0, %v1239_v61, %v1241_v7  ;;  %4465 = vmatprep.subr.bf16.mxu0 %v4812_v63  ;;  %v4809_v17 = vld [vmem:[%s6843_s3 + $0x1e0] ss:$12 sps:$4 sm:$0xff]  }
 0x115   : > { %v652_v24 = vadd.f32 %v5272_v12, %v651_v21  ;;  %v4442_v26 = vpop.f32.mrb[10].mxu0  ;;  %v1238_v27 = vsel %vm1227_vm0, %v1235_v1, %v1237_v15  ;;  %2399 = vmatpush1.bf16.msra.mxu1 %v4799_v5  ;;  %v1240_v28 = vsel %vm1227_vm0, %v1237_v15, %v1239_v61  ;;  %v1463_v39 = vsel %vm1452_vm1, %v1460_v2, %v1462_v16 }
 0x116   : > { %v5367_v29 = vmax.f32 %v660_v20, 0.0  ;;  %v663_v30 = vadd.f32 %v4442_v26, %v5272_v12  ;;  %v654_v31 = vpop.f32.mrb[11].mxu0  ;;  %v5370_v32 = vpack.c.bf16 %v1238_v27, %v1236_v22  ;;  %v5372_v33 = vpack.c.bf16 %v1242_v23, %v1240_v28  ;;  %2400 = vmatprep.subr.bf16.mxu1 %v4804_v13  ;;  %v4815_v22 = vld [vmem:[%s6843_s3 + $0x1fc] ss:$12 sps:$4 sm:$0xff]   ;;  %v4825_v27 = vld [vmem:[%s6843_s3 + $0x200] ss:$12 sps:$4 sm:$0xff]  }
 0x117   : > { %v5380_v36 = vmax.f32 %v652_v24, 0.0  ;;  %v655_v37 = vadd.f32 %v5272_v12, %v654_v31  ;;  %4466 = vmatpush3.bf16.msra.mxu0 %v4812_v63  ;;  %v1465_v40 = vsel %vm1452_vm1, %v1462_v16, %v1464_v6  ;;  %v1466_v41 = vrot.slane %v5319_v62, 1 }
 0x118   : > { %v1247_v42 = vrot.slane %v5367_v29, 7  ;;  %v5392_v43 = vmax.f32 %v663_v30, 0.0  ;;  %3898 = vmatmul.mubr.msk.bf16.gmra.mrb[4].mxu1 %vm5358_vm6, %v5310_v55  ;;  %4026 = vmatmul.mubr.msk.bf16.gmra.mrb[36].mxu0 %vm5358_vm6, %v5310_v55  ;;  %v5407_v48 = vpack.c.bf16 %v1465_v40, %v1463_v39  ;;  %v1472_v24 = vrot.slane %v5367_v29, 1 }
 0x119   : > { %v1243_v45 = vrot.slane %v5380_v36, 7  ;;  %v1468_v46 = vrot.slane %v5380_v36, 1  ;;  %v5405_v47 = vmax.f32 %v655_v37, 0.0  ;;  %2257 = vmatprep.mubr.bf16.mxu1 %v1684_v18  ;;  %2633 = vmatprep.mubr.bf16.mxu0 %v1684_v18  ;;  %v1467_v62 = vsel %vm1452_vm1, %v1464_v6, %v1466_v41  ;;  %v4824_v18 = vld [vmem:[%s6843_s3 + $0x1e8] ss:$12 sps:$4 sm:$0xff]  }
 0x11a   : > { %v1249_v49 = vrot.slane %v5392_v43, 7  ;;  %2401 = vmatpush1.bf16.msra.mxu1 %v4802_v34  ;;  %v5417_v53 = vpack.c.bf16 %v5392_v43, %v5367_v29  ;;  %4467 = vmatprep.subr.bf16.mxu0 %v4816_v35  ;;  %vm5494_vm9 = vcmp.ne.s32.totalorder %v857_v52, 0  ;;  %v5502_v34 = vadd.s32 80, %v5267_v11 }
 0x11b   : > { %v1245_v55 = vrot.slane %v5405_v47, 7  ;;  %v4445_v56 = vpop.f32.mrb[12].mxu0  ;;  %v5425_v57 = vpack.c.bf16 %v5405_v47, %v5380_v36  ;;  %v1244_v59 = vsel %vm1227_vm0, %v1241_v7, %v1243_v45  ;;  %2402 = vmatprep.subr.bf16.mxu1 %v4807_v38  ;;  %4468 = vmatpush3.bf16.msra.mxu0 %v4816_v35  ;;  %v1470_v61 = vrot.slane %v5405_v47, 1  ;;  %vm5532_vm10 = vmpackc.low %vm4952_vm3, %vm5494_vm9 }
 0x11c   : > { %v676_v63 = vadd.f32 %v4445_v56, %v5272_v12  ;;  %v667_v1 = vpop.f32.mrb[13].mxu0  ;;  %v1250_v2 = vsel %vm1227_vm0, %v1247_v42, %v1249_v49  ;;  %4469 = vmatprep.subr.bf16.mxu0 %v4820_v44  ;;  %v1469_v13 = vsel %vm1452_vm1, %v1466_v41, %v1468_v46  ;;  %v1474_v36 = vrot.slane %v5392_v43, 1  ;;  %v4819_v41 = vld [vmem:[%s6843_s3 + $0x214] ss:$12 sps:$4 sm:$0xff]  }
 0x11d   : > { %v668_v4 = vadd.f32 %v5272_v12, %v667_v1  ;;  %v4446_v5 = vpop.f32.mrb[14].mxu0  ;;  %v1246_v7 = vsel %vm1227_vm0, %v1243_v45, %v1245_v55  ;;  %v1248_v8 = vsel %vm1227_vm0, %v1245_v55, %v1247_v42  ;;  %v5474_v23 = vpack.c.bf16 %v1469_v13, %v1467_v62  ;;  %v4826_v1 = vld [vmem:[%s6843_s3 + $0x218] ss:$12 sps:$4 sm:$0xff]  }
 0x11e   : > { %v5455_v14 = vmax.f32 %v676_v63, 0.0  ;;  %v679_v51 = vadd.f32 %v4446_v5, %v5272_v12  ;;  %v670_v6 = vpop.f32.mrb[15].mxu0  ;;  %v5458_v15 = vpack.c.bf16 %v1246_v7, %v1244_v59  ;;  %v5460_v16 = vpack.c.bf16 %v1250_v2, %v1248_v8  ;;  %2403 = vmatpush1.bf16.msra.mxu1 %v4805_v54  ;;  %v4817_v63 = vld [vmem:[%s6843_s3 + $0x210] ss:$12 sps:$4 sm:$0xff]  }
 0x11f   : > { %v5468_v20 = vmax.f32 %v668_v4, 0.0  ;;  %v671_v21 = vadd.f32 %v5272_v12, %v670_v6  ;;  %2404 = vmatprep.subr.bf16.mxu1 %v4811_v60  ;;  %4470 = vmatpush3.bf16.msra.mxu0 %v4820_v44  ;;  %v1471_v30 = vsel %vm1452_vm1, %v1468_v46, %v1470_v61  ;;  %v1473_v43 = vsel %vm1452_vm1, %v1470_v61, %v1472_v24  ;;  %v4827_v8 = vld [vmem:[%s6843_s3 + $0x230] ss:$12 sps:$4 sm:$0xff]  }
 0x120   : > { %v1255_v26 = vrot.slane %v5455_v14, 7  ;;  %3902 = vmatmul.mubr.msk.bf16.gmra.mrb[8].mxu1 %vm5447_vm8, %v5370_v32  ;;  %4030 = vmatmul.mubr.msk.bf16.gmra.mrb[40].mxu0 %vm5447_vm8, %v5370_v32  ;;  %v5484_v9 = vmax.f32 %v679_v51, 0.0  ;;  %v871_v32 = vand.u32 15, %v5428_v58  ;;  %v5539_v55 = vpack.c.bf16 %v1473_v43, %v1471_v30 }
 0x121   : > { %v1251_v25 = vrot.slane %v5468_v20, 7  ;;  %2267 = vmatprep.mubr.bf16.mxu1 %v5338_v10  ;;  %2641 = vmatprep.mubr.bf16.mxu0 %v5338_v10  ;;  %v5492_v28 = vmax.f32 %v671_v21, 0.0  ;;  %v4813_v10 = vld [vmem:[%s6843_s3 + $0x1f8] ss:$12 sps:$4 sm:$0xff]   ;;  %v1476_v42 = vrot.slane %v5468_v20, 1  ;;  %v1475_v4 = vsel %vm1452_vm1, %v1472_v24, %v1474_v36 }
 0x122   : > { %v1257_v31 = vrot.slane %v5484_v9, 7  ;;  %v5506_v35 = vpack.c.bf16 %v5484_v9, %v5455_v14  ;;  %2405 = vmatpush1.bf16.msra.mxu1 %v4809_v17  ;;  %4471 = vmatprep.subr.bf16.mxu0 %v4824_v18  ;;  %vm5579_vm11 = vcmp.ne.s32.totalorder %v871_v32, 0  ;;  %v885_v21 = vand.u32 15, %v5502_v34 }
 0x123   : > { %v1253_v37 = vrot.slane %v5492_v28, 7  ;;  %v4449_v38 = vpop.f32.mrb[16].mxu0  ;;  %v5515_v39 = vpack.c.bf16 %v5492_v28, %v5468_v20  ;;  %v1252_v40 = vsel %vm1227_vm0, %v1249_v49, %v1251_v25  ;;  %2406 = vmatprep.subr.bf16.mxu1 %v4815_v22  ;;  %4472 = vmatpush3.bf16.msra.mxu0 %v4824_v18  ;;  %v1477_v13 = vsel %vm1452_vm1, %v1474_v36, %v1476_v42  ;;  %vm5617_vm12 = vmpackc.low %vm4952_vm3, %vm5579_vm11 }
 0x124   : > { %v692_v44 = vadd.f32 %v4449_v38, %v5272_v12  ;;  %v683_v45 = vpop.f32.mrb[17].mxu0  ;;  %v1258_v46 = vsel %vm1227_vm0, %v1255_v26, %v1257_v31  ;;  %4473 = vmatprep.subr.bf16.mxu0 %v4825_v27  ;;  %v1478_v51 = vrot.slane %v5492_v28, 1  ;;  %v5595_v24 = vpack.c.bf16 %v1477_v13, %v1475_v4 }
 0x125   : > { %v684_v49 = vadd.f32 %v5272_v12, %v683_v45  ;;  %v4450_v50 = vpop.f32.mrb[18].mxu0  ;;  %v1254_v52 = vsel %vm1227_vm0, %v1251_v25, %v1253_v37  ;;  %v1256_v54 = vsel %vm1227_vm0, %v1253_v37, %v1255_v26  ;;  %v1480_v26 = vrot.slane %v5455_v14, 1 }
 0x126   : > { %v5541_v56 = vmax.f32 %v692_v44, 0.0  ;;  %v695_v58 = vadd.f32 %v4450_v50, %v5272_v12  ;;  %v686_v59 = vpop.f32.mrb[19].mxu0  ;;  %v5544_v60 = vpack.c.bf16 %v1254_v52, %v1252_v40  ;;  %v5546_v61 = vpack.c.bf16 %v1258_v46, %v1256_v54  ;;  %2407 = vmatpush1.bf16.msra.mxu1 %v4813_v10 }
 0x127   : > { %v5554_v2 = vmax.f32 %v684_v49, 0.0  ;;  %v687_v62 = vadd.f32 %v5272_v12, %v686_v59  ;;  %2408 = vmatprep.subr.bf16.mxu1 %v4819_v41  ;;  %4474 = vmatpush3.bf16.msra.mxu0 %v4825_v27  ;;  %v5608_v32 = vadd.s32 96, %v5267_v11  ;;  %v5611_v14 = vadd.s32 112, %v5267_v11 }
 0x128   : > { %3906 = vmatmul.mubr.msk.bf16.gmra.mrb[12].mxu1 %vm5532_vm10, %v5372_v33  ;;  %4034 = vmatmul.mubr.msk.bf16.gmra.mrb[44].mxu0 %vm5532_vm10, %v5372_v33  ;;  %v1263_v5 = vrot.slane %v5541_v56, 7  ;;  %v5568_v7 = vmax.f32 %v695_v58, 0.0  ;;  %v1479_v41 = vsel %vm1452_vm1, %v1476_v42, %v1478_v51  ;;  %v1481_v52 = vsel %vm1452_vm1, %v1478_v51, %v1480_v26 }
 0x129   : > { %2277 = vmatprep.mubr.bf16.mxu1 %v5425_v57  ;;  %2649 = vmatprep.mubr.bf16.mxu0 %v5425_v57  ;;  %v1259_v6 = vrot.slane %v5554_v2, 7  ;;  %v5584_v17 = vmax.f32 %v687_v62, 0.0  ;;  %v4821_v57 = vld [vmem:[%s6843_s3 + $0x228] ss:$12 sps:$4 sm:$0xff]   ;;  %v1482_v20 = vrot.slane %v5484_v9, 1  ;;  %v5648_v58 = vpack.c.bf16 %v1481_v52, %v1479_v41 }
 0x12a   : > { %v1265_v18 = vrot.slane %v5568_v7, 7  ;;  %v5590_v22 = vpack.c.bf16 %v5568_v7, %v5541_v56  ;;  %2409 = vmatpush1.bf16.msra.mxu1 %v4817_v63  ;;  %4475 = vmatprep.subr.bf16.mxu0 %v4826_v1  ;;  %v1484_v59 = vrot.slane %v5554_v2, 1  ;;  %vm5653_vm13 = vcmp.ne.s32.totalorder %v885_v21, 0 }
 0x12b   : > { %v1261_v27 = vrot.slane %v5584_v17, 7  ;;  %v4453_v25 = vpop.f32.mrb[20].mxu0  ;;  %v5601_v28 = vpack.c.bf16 %v5584_v17, %v5554_v2  ;;  %v1260_v29 = vsel %vm1227_vm0, %v1257_v31, %v1259_v6  ;;  %2410 = vmatprep.subr.bf16.mxu1 %v4823_v3  ;;  %4476 = vmatpush3.bf16.msra.mxu0 %v4826_v1  ;;  %v913_v3 = vand.u32 15, %v5611_v14  ;;  %vm5683_vm14 = vmpackc.low %vm4952_vm3, %vm5653_vm13 }
 0x12c   : > { %v708_v30 = vadd.f32 %v4453_v25, %v5272_v12  ;;  %v699_v34 = vpop.f32.mrb[21].mxu0  ;;  %v1266_v10 = vsel %vm1227_vm0, %v1263_v5, %v1265_v18  ;;  %4477 = vmatprep.subr.bf16.mxu0 %v4827_v8  ;;  %v1486_v51 = vrot.slane %v5584_v17, 1 }
 0x12d   : > { %v700_v31 = vadd.f32 %v5272_v12, %v699_v34  ;;  %v4454_v37 = vpop.f32.mrb[22].mxu0  ;;  %v1262_v38 = vsel %vm1227_vm0, %v1259_v6, %v1261_v27  ;;  %v1264_v40 = vsel %vm1227_vm0, %v1261_v27, %v1263_v5  ;;  %v5669_v5 = vadd.s32 128, %v5267_v11 }
 0x12e   : > { %v5627_v44 = vmax.f32 %v708_v30, 0.0  ;;  %v711_v45 = vadd.f32 %v4454_v37, %v5272_v12  ;;  %v702_v46 = vpop.f32.mrb[23].mxu0  ;;  %v5630_v43 = vpack.c.bf16 %v1262_v38, %v1260_v29  ;;  %v5632_v47 = vpack.c.bf16 %v1266_v10, %v1264_v40  ;;  %2411 = vmatpush1.bf16.msra.mxu1 %v4821_v57 }
 0x12f   : > { %v5634_v49 = vmax.f32 %v700_v31, 0.0  ;;  %v703_v50 = vadd.f32 %v5272_v12, %v702_v46  ;;  %4478 = vmatpush3.bf16.msra.mxu0 %v4827_v8  ;;  %v1483_v57 = vsel %vm1452_vm1, %v1480_v26, %v1482_v20  ;;  %v1485_v30 = vsel %vm1452_vm1, %v1482_v20, %v1484_v59 }
 0x130   : > { %3910 = vmatmul.mubr.msk.bf16.gmra.mrb[16].mxu1 %vm5617_vm12, %v5458_v15  ;;  %4038 = vmatmul.mubr.msk.bf16.gmra.mrb[48].mxu0 %vm5617_vm12, %v5458_v15  ;;  %v1271_v42 = vrot.slane %v5627_v44, 7  ;;  %v5646_v54 = vmax.f32 %v711_v45, 0.0  ;;  %v899_v15 = vand.u32 15, %v5608_v32  ;;  %v5701_v37 = vpack.c.bf16 %v1485_v30, %v1483_v57 }
 0x131   : > { %2287 = vmatprep.mubr.bf16.mxu1 %v5417_v53  ;;  %2657 = vmatprep.mubr.bf16.mxu0 %v5417_v53  ;;  %v1267_v63 = vrot.slane %v5634_v49, 7  ;;  %v5658_v1 = vmax.f32 %v703_v50, 0.0  ;;  %v1488_v38 = vrot.slane %v5541_v56, 1  ;;  %v1487_v50 = vsel %vm1452_vm1, %v1484_v59, %v1486_v51 }
 0x132   : > { %v1273_v62 = vrot.slane %v5646_v54, 7  ;;  %v5665_v2 = vpack.c.bf16 %v5646_v54, %v5627_v44  ;;  %vm5715_vm15 = vcmp.ne.s32.totalorder %v899_v15, 0  ;;  %vm5723_vm2 = vcmp.ne.s32.totalorder %v913_v3, 0 }
 0x133   : > { %v1269_v53 = vrot.slane %v5658_v1, 7  ;;  %v4457_v4 = vpop.f32.mrb[24].mxu0  ;;  %v5673_v8 = vpack.c.bf16 %v5658_v1, %v5634_v49  ;;  %v1268_v13 = vsel %vm1227_vm0, %v1265_v18, %v1267_v63  ;;  %v927_v52 = vand.u32 15, %v5669_v5  ;;  %vm5747_vm4 = vmpackc.low %vm4952_vm3, %vm5715_vm15 }
 0x134   : > { %v724_v33 = vadd.f32 %v4457_v4, %v5272_v12  ;;  %v715_v6 = vpop.f32.mrb[25].mxu0  ;;  %v1274_v21 = vsel %vm1227_vm0, %v1271_v42, %v1273_v62  ;;  %v1492_v3 = vrot.slane %v5634_v49, 1  ;;  %vm3920_vm5 = vmpackc.low %vm4952_vm3, %vm5723_vm2 }
 0x135   : > { %v716_v25 = vadd.f32 %v5272_v12, %v715_v6  ;;  %v4458_v29 = vpop.f32.mrb[26].mxu0  ;;  %v1270_v18 = vsel %vm1227_vm0, %v1267_v63, %v1269_v53  ;;  %v1272_v17 = vsel %vm1227_vm0, %v1269_v53, %v1271_v42  ;;  %v1490_v42 = vrot.slane %v5568_v7, 1 }
 0x136   : > { %v5691_v32 = vmax.f32 %v724_v33, 0.0  ;;  %v727_v26 = vadd.f32 %v4458_v29, %v5272_v12  ;;  %v718_v34 = vpop.f32.mrb[27].mxu0  ;;  %v5694_v14 = vpack.c.bf16 %v1270_v18, %v1268_v13  ;;  %v5696_v10 = vpack.c.bf16 %v1274_v21, %v1272_v17 }
 0x137   : > { %v5698_v36 = vmax.f32 %v716_v25, 0.0  ;;  %v719_v31 = vadd.f32 %v5272_v12, %v718_v34  ;;  %v1489_v33 = vsel %vm1452_vm1, %v1486_v51, %v1488_v38  ;;  %v1496_v17 = vrot.slane %v5627_v44, 1 }
 0x138   : > { %3914 = vmatmul.mubr.msk.bf16.gmra.mrb[20].mxu1 %vm5683_vm14, %v5460_v16  ;;  %4042 = vmatmul.mubr.msk.bf16.gmra.mrb[52].mxu0 %vm5683_vm14, %v5460_v16  ;;  %v1279_v40 = vrot.slane %v5691_v32, 7  ;;  %v5711_v41 = vmax.f32 %v727_v26, 0.0  ;;  %v5754_v57 = vpack.c.bf16 %v1489_v33, %v1487_v50  ;;  %v1491_v34 = vsel %vm1452_vm1, %v1488_v38, %v1490_v42 }
 0x139   : > { %2297 = vmatprep.mubr.bf16.mxu1 %v5515_v39  ;;  %2665 = vmatprep.mubr.bf16.mxu0 %v5515_v39  ;;  %v1275_v56 = vrot.slane %v5698_v36, 7  ;;  %v5720_v46 = vmax.f32 %v719_v31, 0.0  ;;  %v1498_v31 = vrot.slane %v5646_v54, 1  ;;  %v1493_v44 = vsel %vm1452_vm1, %v1490_v42, %v1492_v3 }
 0x13a   : > { %v1281_v20 = vrot.slane %v5711_v41, 7  ;;  %v5731_v39 = vpack.c.bf16 %v5711_v41, %v5691_v32  ;;  %v1504_v38 = vrot.slane %v5691_v32, 1  ;;  %v1506_v42 = vrot.slane %v5711_v41, 1 }
 0x13b   : > { %v1277_v9 = vrot.slane %v5720_v46, 7  ;;  %v4461_v63 = vpop.f32.mrb[28].mxu0  ;;  %v5737_v59 = vpack.c.bf16 %v5720_v46, %v5698_v36  ;;  %v1276_v15 = vsel %vm1227_vm0, %v1273_v62, %v1275_v56 }
 0x13c   : > { %v740_v53 = vadd.f32 %v4461_v63, %v5272_v12  ;;  %v731_v4 = vpop.f32.mrb[29].mxu0  ;;  %v1282_v13 = vsel %vm1227_vm0, %v1279_v40, %v1281_v20  ;;  %v5783_v63 = vpack.c.bf16 %v1493_v44, %v1491_v34  ;;  %v799_v44 = vadd.s32 160, %v5267_v11 }
 0x13d   : > { %v732_v6 = vadd.f32 %v5272_v12, %v731_v4  ;;  %v4462_v21 = vpop.f32.mrb[30].mxu0  ;;  %v1278_v62 = vsel %vm1227_vm0, %v1275_v56, %v1277_v9  ;;  %v1280_v49 = vsel %vm1227_vm0, %v1277_v9, %v1279_v40  ;;  %v1500_v9 = vrot.slane %v5698_v36, 1 }
 0x13e   : > { %v5756_v27 = vmax.f32 %v740_v53, 0.0  ;;  %v743_v51 = vadd.f32 %v4462_v21, %v5272_v12  ;;  %v734_v25 = vpop.f32.mrb[31].mxu0  ;;  %v5759_v29 = vpack.c.bf16 %v1278_v62, %v1276_v15  ;;  %v5761_v18 = vpack.c.bf16 %v1282_v13, %v1280_v49 }
 0x13f   : > { %v774_v30 = vmax.f32 %v732_v6, 0.0  ;;  %v735_v26 = vadd.f32 %v5272_v12, %v734_v25  ;;  %v1494_v12 = vrot.slane %v5658_v1, 1  ;;  %v1502_v1 = vrot.slane %v5720_v46, 1 }
 0x140   : > { %3918 = vmatmul.mubr.msk.bf16.gmra.mrb[24].mxu1 %vm5747_vm4, %v5544_v60  ;;  %4046 = vmatmul.mubr.msk.bf16.gmra.mrb[56].mxu0 %vm5747_vm4, %v5544_v60  ;;  %v1287_v40 = vrot.slane %v5756_v27, 7  ;;  %v777_v45 = vmax.f32 %v743_v51, 0.0  ;;  %v1499_v62 = vsel %vm1452_vm1, %v1496_v17, %v1498_v31  ;;  %v1501_v16 = vsel %vm1452_vm1, %v1498_v31, %v1500_v9 }
 0x141   : > { %2307 = vmatprep.mubr.bf16.mxu1 %v5506_v35  ;;  %2673 = vmatprep.mubr.bf16.mxu0 %v5506_v35  ;;  %v1283_v56 = vrot.slane %v774_v30, 7  ;;  %v775_v50 = vmax.f32 %v735_v26, 0.0  ;;  %v1508_v32 = vrot.slane %v774_v30, 1  ;;  %v1495_v41 = vsel %vm1452_vm1, %v1492_v3, %v1494_v12 }
 0x142   : > { %v1289_v60 = vrot.slane %v777_v45, 7  ;;  %v5781_v54 = vpack.c.bf16 %v777_v45, %v5756_v27  ;;  %v1514_v4 = vrot.slane %v777_v45, 1  ;;  %v1497_v7 = vsel %vm1452_vm1, %v1494_v12, %v1496_v17 }
 0x143   : > { %v1285_v15 = vrot.slane %v775_v50, 7  ;;  %v5786_v53 = vpack.c.bf16 %v775_v50, %v774_v30  ;;  %v1284_v35 = vsel %vm1227_vm0, %v1281_v20, %v1283_v56  ;;  %v1510_v6 = vrot.slane %v775_v50, 1 }
 0x144   : > { %v1290_v13 = vsel %vm1227_vm0, %v1287_v40, %v1289_v60  ;;  %v5802_v21 = vpack.c.bf16 %v1497_v7, %v1495_v41  ;;  %v1512_v49 = vrot.slane %v5756_v27, 1  ;;  %v5809_v3 = vpack.c.bf16 %v1501_v16, %v1499_v62 }
 0x145   : > { %v1286_v36 = vsel %vm1227_vm0, %v1283_v56, %v1285_v15  ;;  %v1288_v33 = vsel %vm1227_vm0, %v1285_v15, %v1287_v40  ;;  %v1503_v51 = vsel %vm1452_vm1, %v1500_v9, %v1502_v1  ;;  %v1505_v25 = vsel %vm1452_vm1, %v1502_v1, %v1504_v38 }
 0x146   : > { %v5798_v20 = vpack.c.bf16 %v1286_v36, %v1284_v35  ;;  %v5800_v46 = vpack.c.bf16 %v1290_v13, %v1288_v33  ;;  %vm4189_vm0 = vcmp.ne.s32.totalorder %v927_v52, 0  ;;  %v797_v17 = vadd.s32 144, %v5267_v11 }
 0x147   : > { %v5818_v30 = vpack.c.bf16 %v1505_v25, %v1503_v51  ;;  %v1507_v27 = vsel %vm1452_vm1, %v1504_v38, %v1506_v42  ;;  %v1509_v26 = vsel %vm1452_vm1, %v1506_v42, %v1508_v32  ;;  %v1511_v34 = vsel %vm1452_vm1, %v1508_v32, %v1510_v6  ;;  %vm3924_vm6 = vmpackc.low %vm4952_vm3, %vm4189_vm0 }
 0x148   : > { %3922 = vmatmul.mubr.msk.bf16.gmra.mrb[28].mxu1 %vm3920_vm5, %v5546_v61  ;;  %4050 = vmatmul.mubr.msk.bf16.gmra.mrb[60].mxu0 %vm3920_vm5, %v5546_v61  ;;  %v1548_v61 = vsel %vm1452_vm1, %v1514_v4, 0.0  ;;  %v5824_v31 = vpack.c.bf16 %v1509_v26, %v1507_v27  ;;  %v1513_v40 = vsel %vm1452_vm1, %v1510_v6, %v1512_v49  ;;  %v941_v45 = vand.u32 15, %v797_v17 }
 0x149   : > { %2317 = vmatprep.mubr.bf16.mxu1 %v5601_v28  ;;  %2681 = vmatprep.mubr.bf16.mxu0 %v5601_v28  ;;  %v1515_v28 = vsel %vm1452_vm1, %v1512_v49, %v1514_v4  ;;  %v5829_v5 = vpack.c.bf16 %v1513_v40, %v1511_v34  ;;  %v955_v12 = vand.u32 15, %v799_v44  ;;  %v780_v38 = vadd.s32 8, %v5267_v11 }
 0x14a   : > { %v5831_v52 = vpack.c.bf16 %v1548_v61, %v1515_v28  ;;  %vm4190_vm7 = vcmp.ne.s32.totalorder %v941_v45, 0  ;;  %v784_v50 = vadd.s32 40, %v5267_v11  ;;  %v786_v15 = vadd.s32 56, %v5267_v11 }
 0x14b   : > { %vm3928_vm1 = vmpackc.low %vm4952_vm3, %vm4190_vm7  ;;  %vm4191_vm8 = vcmp.ne.s32.totalorder %v955_v12, 0  ;;  %v822_v56 = vand.u32 15, %v780_v38  ;;  %v790_v13 = vadd.s32 88, %v5267_v11  ;;  %v792_v36 = vadd.s32 104, %v5267_v11  ;;  %v4831_v38 = vld [vmem:[%s6845_s5 + $0x18] sm:$0xff]  }
 0x14c   : > { %vm3932_vm9 = vmpackc.low %vm4952_vm3, %vm4191_vm8  ;;  %v850_v42 = vand.u32 15, %v784_v50  ;;  %v864_v32 = vand.u32 15, %v786_v15  ;;  %v794_v6 = vadd.s32 120, %v5267_v11  ;;  %v798_v49 = vadd.s32 152, %v5267_v11 }
 0x14d   : > { %vm4197_vm0 = vcmp.ne.s32.totalorder %v822_v56, 15  ;;  %v892_v41 = vand.u32 15, %v790_v13  ;;  %v906_v7 = vand.u32 15, %v792_v36  ;;  %v800_v51 = vadd.s32 168, %v5267_v11 }
 0x14e   : > { %vm5878_vm7 = vmpackc.low %vm4197_vm0, %vm4952_vm3  ;;  %vm4199_vm8 = vcmp.ne.s32.totalorder %v850_v42, 15  ;;  %v920_v62 = vand.u32 15, %v794_v6  ;;  %v948_v17 = vand.u32 15, %v798_v49  ;;  %v802_v27 = vadd.s32 184, %v5267_v11  ;;  %v4834_v42 = vld [vmem:[%s6845_s5 + $0x30] sm:$0xff]  }
 0x14f   : > { %v962_v61 = vand.u32 15, %v800_v51  ;;  %v804_v26 = vadd.s32 200, %v5267_v11  ;;  %v806_v45 = vadd.s32 216, %v5267_v11  ;;  %v808_v44 = vadd.s32 232, %v5267_v11 }
 0x150   : > { %3926 = vmatmul.mubr.msk.bf16.gmra.mrb[32].mxu1 %vm3924_vm6, %v5630_v43  ;;  %4054 = vmatmul.mubr.msk.bf16.gmra.mrb[64].mxu0 %vm3924_vm6, %v5630_v43  ;;  %v801_v43 = vadd.s32 176, %v5267_v11  ;;  %vm4204_vm0 = vcmp.ne.s32.totalorder %v920_v62, 15  ;;  %v976_v40 = vand.u32 15, %v802_v27 }
 0x151   : > { %2327 = vmatprep.mubr.bf16.mxu1 %v5590_v22  ;;  %2689 = vmatprep.mubr.bf16.mxu0 %v5590_v22  ;;  %v990_v28 = vand.u32 15, %v804_v26 }
 0x152   : > { %v969_v22 = vand.u32 15, %v801_v43  ;;  %v1004_v43 = vand.u32 15, %v806_v45 }
 0x154   : > { %vm4192_vm10 = vcmp.ne.s32.totalorder %v969_v22, 0  ;;  %v1018_v22 = vand.u32 15, %v808_v44 }
 0x155   : > { %vm3936_vm11 = vmpackc.low %vm4952_vm3, %vm4192_vm10 }
 0x156   : > { %vm5896_vm10 = vmpackc.low %vm4199_vm8, %vm4952_vm3  ;;  %vm4206_vm8 = vcmp.ne.s32.totalorder %v948_v17, 15 }
 0x158   : > { %3930 = vmatmul.mubr.msk.bf16.gmra.mrb[36].mxu1 %vm3928_vm1, %v5632_v47  ;;  %4058 = vmatmul.mubr.msk.bf16.gmra.mrb[68].mxu0 %vm3928_vm1, %v5632_v47  ;;  %v803_v47 = vadd.s32 192, %v5267_v11 }
 0x159   : > { %2337 = vmatprep.mubr.bf16.mxu1 %v5673_v8  ;;  %2697 = vmatprep.mubr.bf16.mxu0 %v5673_v8 }
 0x15a   : > { %v983_v8 = vand.u32 15, %v803_v47  ;;  %v810_v47 = vadd.s32 248, %v5267_v11 }
 0x15c   : > { %vm4193_vm12 = vcmp.ne.s32.totalorder %v983_v8, 0 }
 0x15d   : > { %vm3940_vm13 = vmpackc.low %vm4952_vm3, %vm4193_vm12 }
 0x160   : > { %3934 = vmatmul.mubr.msk.bf16.gmra.mrb[40].mxu1 %vm3932_vm9, %v5694_v14  ;;  %4062 = vmatmul.mubr.msk.bf16.gmra.mrb[72].mxu0 %vm3932_vm9, %v5694_v14  ;;  %v805_v14 = vadd.s32 208, %v5267_v11 }
 0x161   : > { %2347 = vmatprep.mubr.bf16.mxu1 %v5665_v2  ;;  %2705 = vmatprep.mubr.bf16.mxu0 %v5665_v2 }
 0x162   : > { %v997_v2 = vand.u32 15, %v805_v14  ;;  %v1032_v14 = vand.u32 15, %v810_v47 }
 0x164   : > { %vm4194_vm14 = vcmp.ne.s32.totalorder %v997_v2, 0 }
 0x165   : > { %vm3944_vm15 = vmpackc.low %vm4952_vm3, %vm4194_vm14 }
 0x168   : > { %3938 = vmatmul.mubr.msk.bf16.gmra.mrb[44].mxu1 %vm3936_vm11, %v5696_v10  ;;  %4066 = vmatmul.mubr.msk.bf16.gmra.mrb[76].mxu0 %vm3936_vm11, %v5696_v10  ;;  %v807_v10 = vadd.s32 224, %v5267_v11  ;;  %vm4200_vm11 = vcmp.ne.s32.totalorder %v864_v32, 15 }
 0x169   : > { %2357 = vmatprep.mubr.bf16.mxu1 %v5737_v59  ;;  %2713 = vmatprep.mubr.bf16.mxu0 %v5737_v59 }
 0x16a   : > { %v1011_v59 = vand.u32 15, %v807_v10 }
 0x16c   : > { %vm4195_vm2 = vcmp.ne.s32.totalorder %v1011_v59, 0 }
 0x16d   : > { %vm3948_vm4 = vmpackc.low %vm4952_vm3, %vm4195_vm2  ;;  %vm4203_vm2 = vcmp.ne.s32.totalorder %v906_v7, 15 }
 0x170   : > { %3942 = vmatmul.mubr.msk.bf16.gmra.mrb[48].mxu1 %vm3940_vm13, %v5759_v29  ;;  %4070 = vmatmul.mubr.msk.bf16.gmra.mrb[80].mxu0 %vm3940_vm13, %v5759_v29  ;;  %v809_v29 = vadd.s32 240, %v5267_v11  ;;  %vm5913_vm13 = vmpackc.low %vm4200_vm11, %vm4952_vm3 }
 0x171   : > { %2367 = vmatprep.mubr.bf16.mxu1 %v5731_v39  ;;  %2721 = vmatprep.mubr.bf16.mxu0 %v5731_v39 }
 0x172   : > { %v1025_v39 = vand.u32 15, %v809_v29 }
 0x174   : > { %vm4196_vm5 = vcmp.ne.s32.totalorder %v1025_v39, 0 }
 0x175   : > { %vm3952_vm6 = vmpackc.low %vm4952_vm3, %vm4196_vm5 }
 0x176   : > { %vm5940_vm5 = vmpackc.low %vm4203_vm2, %vm4952_vm3  ;;  %vm4210_vm2 = vcmp.ne.s32.totalorder %v1004_v43, 15 }
 0x178   : > { %3946 = vmatmul.mubr.msk.bf16.gmra.mrb[52].mxu1 %vm3944_vm15, %v5761_v18  ;;  %4074 = vmatmul.mubr.msk.bf16.gmra.mrb[84].mxu0 %vm3944_vm15, %v5761_v18  ;;  %v782_v18 = vadd.s32 24, %v5267_v11  ;;  %vm4202_vm15 = vcmp.ne.s32.totalorder %v892_v41, 15 }
 0x179   : > { %2377 = vmatprep.mubr.bf16.mxu1 %v5786_v53  ;;  %2729 = vmatprep.mubr.bf16.mxu0 %v5786_v53  ;;  %v788_v53 = vadd.s32 72, %v5267_v11 }
 0x17a   : > { %v836_v60 = vand.u32 15, %v782_v18 }
 0x17b   : > { %v878_v4 = vand.u32 15, %v788_v53 }
 0x17c   : > { %vm4198_vm1 = vcmp.ne.s32.totalorder %v836_v60, 15 }
 0x17d   : > { %vm5891_vm9 = vmpackc.low %vm4198_vm1, %vm4952_vm3  ;;  %vm4201_vm12 = vcmp.ne.s32.totalorder %v878_v4, 15 }
 0x17e   : > { %vm5918_vm14 = vmpackc.low %vm4201_vm12, %vm4952_vm3  ;;  %vm4208_vm12 = vcmp.ne.s32.totalorder %v976_v40, 15 }
 0x180   : > { %3950 = vmatmul.mubr.msk.bf16.gmra.mrb[56].mxu1 %vm3948_vm4, %v5798_v20  ;;  %4078 = vmatmul.mubr.msk.bf16.gmra.mrb[88].mxu0 %vm3948_vm4, %v5798_v20  ;;  %v796_v20 = vadd.s32 136, %v5267_v11  ;;  %vm5935_vm4 = vmpackc.low %vm4202_vm15, %vm4952_vm3 }
 0x181   : > { %2387 = vmatprep.mubr.bf16.mxu1 %v5781_v54  ;;  %2737 = vmatprep.mubr.bf16.mxu0 %v5781_v54  ;;  %v4953_v54 = vmov 0   ;;  %vm6001_vm15 = vmpackc.low %vm4208_vm12, %vm4952_vm3 }
 0x182   : > { %v934_v16 = vand.u32 15, %v796_v20 }
 0x188   : > { %3954 = vmatmul.mubr.msk.bf16.gmra.mrb[60].mxu1 %vm3952_vm6, %v5800_v46  ;;  %4082 = vmatmul.mubr.msk.bf16.gmra.mrb[92].mxu0 %vm3952_vm6, %v5800_v46  ;;  %vm4205_vm6 = vcmp.ne.s32.totalorder %v934_v16, 15 }
 0x189   : > { %4479 = vmatprep.mubr.msk.bf16.mxu0 %vm5878_vm7, %v5324_v0  ;;  %2428 = vmatprep.mubr.bf16.mxu1 %v4953_v54  ;;  %vm5962_vm1 = vmpackc.low %vm4205_vm6, %vm4952_vm3 }
 0x18a   : > { %vm6022_vm6 = vmpackc.low %vm4210_vm2, %vm4952_vm3 }
 0x190   : > { %3958 = vmatmul.mubr.msk.bf16.vlgmr.msra.gmra.mrb[0].mxu1 %vm5878_vm7, %v5324_v0  ;;  %4480 = vmatmul.mubr.msk.bf16.vlgmr.msra.gmra.mrb[96].mxu0 %vm5891_vm9, %v5345_v19  ;;  %vm5957_vm7 = vmpackc.low %vm4204_vm0, %vm4952_vm3  ;;  %vm4211_vm0 = vcmp.ne.s32.totalorder %v1018_v22, 15 }
 0x191   : > { %4483 = vmatprep.mubr.msk.bf16.mxu0 %vm5896_vm10, %v5407_v48  ;;  %2438 = vmatprep.mubr.bf16.mxu1 %v4953_v54 }
 0x198   : > { %3962 = vmatmul.mubr.msk.bf16.gmra.mrb[4].mxu1 %vm5891_vm9, %v5345_v19  ;;  %4484 = vmatmul.mubr.msk.bf16.gmra.mrb[100].mxu0 %vm5913_vm13, %v5474_v23  ;;  %vm4207_vm9 = vcmp.ne.s32.totalorder %v962_v61, 15 }
 0x199   : > { %4487 = vmatprep.mubr.msk.bf16.mxu0 %vm5918_vm14, %v5539_v55  ;;  %2448 = vmatprep.mubr.bf16.mxu1 %v4953_v54  ;;  %vm5984_vm11 = vmpackc.low %vm4207_vm9, %vm4952_vm3 }
 0x1a0   : > { %3966 = vmatmul.mubr.msk.bf16.gmra.mrb[8].mxu1 %vm5896_vm10, %v5407_v48  ;;  %4488 = vmatmul.mubr.msk.bf16.gmra.mrb[104].mxu0 %vm5935_vm4, %v5595_v24  ;;  %vm5979_vm10 = vmpackc.low %vm4206_vm8, %vm4952_vm3  ;;  %vm4212_vm8 = vcmp.ne.s32.totalorder %v1032_v14, 15 }
 0x1a1   : > { %4491 = vmatprep.mubr.msk.bf16.mxu0 %vm5940_vm5, %v5648_v58  ;;  %2458 = vmatprep.mubr.bf16.mxu1 %v4953_v54  ;;  %vm6042_vm9 = vmpackc.low %vm4212_vm8, %vm4952_vm3 }
 0x1a8   : > { %3970 = vmatmul.mubr.msk.bf16.gmra.mrb[12].mxu1 %vm5913_vm13, %v5474_v23  ;;  %4492 = vmatmul.mubr.msk.bf16.gmra.mrb[108].mxu0 %vm5957_vm7, %v5701_v37  ;;  %vm4209_vm13 = vcmp.ne.s32.totalorder %v990_v28, 15 }
 0x1a9   : > { %4495 = vmatprep.mubr.msk.bf16.mxu0 %vm5962_vm1, %v5754_v57  ;;  %2468 = vmatprep.mubr.bf16.mxu1 %v4953_v54 }
 0x1b0   : > { %3974 = vmatmul.mubr.msk.bf16.gmra.mrb[16].mxu1 %vm5918_vm14, %v5539_v55  ;;  %4496 = vmatmul.mubr.msk.bf16.gmra.mrb[112].mxu0 %vm5979_vm10, %v5783_v63  ;;  %vm6006_vm14 = vmpackc.low %vm4209_vm13, %vm4952_vm3 }
 0x1b1   : > { %4499 = vmatprep.mubr.msk.bf16.mxu0 %vm5984_vm11, %v5802_v21  ;;  %2478 = vmatprep.mubr.bf16.mxu1 %v4953_v54 }
 0x1b8   : > { %3978 = vmatmul.mubr.msk.bf16.gmra.mrb[20].mxu1 %vm5935_vm4, %v5595_v24  ;;  %4500 = vmatmul.mubr.msk.bf16.gmra.mrb[116].mxu0 %vm6001_vm15, %v5809_v3  ;;  %vm6027_vm4 = vmpackc.low %vm4211_vm0, %vm4952_vm3  ;;  %vm4955_vm3 = vmmov 0  }
 0x1b9   : > { %4503 = vmatprep.mubr.msk.bf16.mxu0 %vm6006_vm14, %v5818_v30  ;;  %2488 = vmatprep.mubr.bf16.mxu1 %v4953_v54 }
 0x1c0   : > { %3982 = vmatmul.mubr.msk.bf16.gmra.mrb[24].mxu1 %vm5940_vm5, %v5648_v58  ;;  %4504 = vmatmul.mubr.msk.bf16.gmra.mrb[120].mxu0 %vm6022_vm6, %v5824_v31  ;;  %v4828_v58 = vld [vmem:[%s6845_s5] sm:$0xff]   ;;  %vm3678_vm5 = vcmask 523264  }
 0x1c1   : > { %4507 = vmatprep.mubr.msk.bf16.mxu0 %vm6027_vm4, %v5829_v5  ;;  %2498 = vmatprep.mubr.bf16.mxu1 %v4953_v54 }
 0x1c2   : > { %4511 = vmatprep.subr.bf16.mxu0 %v4828_v58 }
 0x1c3   : > { %4512 = vmatpush3.bf16.msra.mxu0 %v4828_v58 }
 0x1c8   : > { %3986 = vmatmul.mubr.msk.bf16.gmra.mrb[28].mxu1 %vm5957_vm7, %v5701_v37  ;;  %4508 = vmatmul.mubr.msk.bf16.gmra.mrb[124].mxu0 %vm6042_vm9, %v5831_v52  ;;  %v4829_v37 = vld [vmem:[%s6845_s5 + $0x8] sm:$0xff]  }
 0x1c9   : > { %2508 = vmatprep.mubr.bf16.mxu1 %v4953_v54  ;;  %4513 = vmatprep.subr.bf16.mxu0 %v4829_v37 }
 0x1ca   : > { %4514 = vmatpush3.bf16.msra.mxu0 %v4829_v37 }
 0x1d0   : > { %3990 = vmatmul.mubr.msk.bf16.gmra.mrb[32].mxu1 %vm5962_vm1, %v5754_v57  ;;  %v4830_v57 = vld [vmem:[%s6845_s5 + $0x10] sm:$0xff]  }
 0x1d1   : > { %2518 = vmatprep.mubr.bf16.mxu1 %v4953_v54  ;;  %4515 = vmatprep.subr.bf16.mxu0 %v4830_v57 }
 0x1d2   : > { %4516 = vmatpush3.bf16.msra.mxu0 %v4830_v57 }
 0x1d3   : > { %4517 = vmatprep.subr.bf16.mxu0 %v4831_v38 }
 0x1d6   : > { %4518 = vmatpush3.bf16.msra.mxu0 %v4831_v38 }
 0x1d8   : > { %3994 = vmatmul.mubr.msk.bf16.gmra.mrb[36].mxu1 %vm5979_vm10, %v5783_v63 }
 0x1d9   : > { %2528 = vmatprep.mubr.bf16.mxu1 %v4953_v54 }
 0x1e0   : > { %3998 = vmatmul.mubr.msk.bf16.gmra.mrb[40].mxu1 %vm5984_vm11, %v5802_v21  ;;  %v4832_v21 = vld [vmem:[%s6845_s5 + $0x20] sm:$0xff]  }
 0x1e1   : > { %2538 = vmatprep.mubr.bf16.mxu1 %v4953_v54  ;;  %4519 = vmatprep.subr.bf16.mxu0 %v4832_v21 }
 0x1e2   : > { %4520 = vmatpush3.bf16.msra.mxu0 %v4832_v21 }
 0x1e3   : > { %v4253_v63 = vpop.f32.mrb[32].mxu0 }
 0x1e4   : > { %v4254_v10 = vpop.f32.mrb[33].mxu0 }
 0x1e5   : > { %v4256_v59 = vpop.f32.mrb[34].mxu0 }
 0x1e6   : > { %v4257_v29 = vpop.f32.mrb[35].mxu0 }
 0x1e8   : > { %4002 = vmatmul.mubr.msk.bf16.gmra.mrb[44].mxu1 %vm6001_vm15, %v5809_v3  ;;  %v4833_v3 = vld [vmem:[%s6845_s5 + $0x28] sm:$0xff]  }
 0x1e9   : > { %2548 = vmatprep.mubr.bf16.mxu1 %v4953_v54  ;;  %4521 = vmatprep.subr.bf16.mxu0 %v4833_v3 }
 0x1ea   : > { %4522 = vmatpush3.bf16.msra.mxu0 %v4833_v3 }
 0x1eb   : > { %v4259_v39 = vpop.f32.mrb[36].mxu0  ;;  %4523 = vmatprep.subr.bf16.mxu0 %v4834_v42 }
 0x1ec   : > { %v4260_v56 = vpop.f32.mrb[37].mxu0 }
 0x1ed   : > { %v6084_v18 = vadd.f32 %v4260_v56, %v4259_v39  ;;  %v4262_v50 = vpop.f32.mrb[38].mxu0 }
 0x1ee   : > { %v4263_v9 = vpop.f32.mrb[39].mxu0  ;;  %4524 = vmatpush3.bf16.msra.mxu0 %v4834_v42 }
 0x1ef   : > { %v6089_v60 = vadd.f32 %v4263_v9, %v4262_v50 }
 0x1f0   : > { %4006 = vmatmul.mubr.msk.bf16.gmra.mrb[48].mxu1 %vm6006_vm14, %v5818_v30  ;;  %v4835_v30 = vld [vmem:[%s6845_s5 + $0x38] sm:$0xff]  }
 0x1f1   : > { %2558 = vmatprep.mubr.bf16.mxu1 %v4953_v54  ;;  %4525 = vmatprep.subr.bf16.mxu0 %v4835_v30 }
 0x1f2   : > { %4526 = vmatpush3.bf16.msra.mxu0 %v4835_v30 }
 0x1f3   : > { %v4265_v15 = vpop.f32.mrb[40].mxu0 }
 0x1f4   : > { %v4266_v53 = vpop.f32.mrb[41].mxu0 }
 0x1f5   : > { %v6098_v35 = vadd.f32 %v4266_v53, %v4265_v15  ;;  %v4268_v1 = vpop.f32.mrb[42].mxu0 }
 0x1f6   : > { %v4269_v32 = vpop.f32.mrb[43].mxu0 }
 0x1f7   : > { %v6103_v4 = vadd.f32 %v4269_v32, %v4268_v1 }
 0x1f8   : > { %4010 = vmatmul.mubr.msk.bf16.gmra.mrb[52].mxu1 %vm6022_vm6, %v5824_v31 }
 0x1f9   : > { %2568 = vmatprep.mubr.bf16.mxu1 %v4953_v54 }
 0x1fb   : > { %v4271_v13 = vpop.f32.mrb[44].mxu0 }
 0x1fc   : > { %v4272_v36 = vpop.f32.mrb[45].mxu0 }
 0x1fd   : > { %v6109_v33 = vadd.f32 %v4272_v36, %v4271_v13  ;;  %v4274_v0 = vpop.f32.mrb[46].mxu0 }
 0x1fe   : > { %v4275_v41 = vpop.f32.mrb[47].mxu0 }
 0x1ff   : > { %v6111_v7 = vadd.f32 %v4275_v41, %v4274_v0 }
 0x200   : > { %4014 = vmatmul.mubr.msk.bf16.gmra.mrb[56].mxu1 %vm6027_vm4, %v5829_v5 }
 0x201   : > { %2578 = vmatprep.mubr.bf16.mxu1 %v4953_v54 }
 0x203   : > { %v4277_v6 = vpop.f32.mrb[48].mxu0 }
 0x204   : > { %v4278_v31 = vpop.f32.mrb[49].mxu0 }
 0x205   : > { %v6117_v20 = vadd.f32 %v4278_v31, %v4277_v6  ;;  %v4280_v46 = vpop.f32.mrb[50].mxu0 }
 0x206   : > { %v4281_v19 = vpop.f32.mrb[51].mxu0 }
 0x207   : > { %v6119_v62 = vadd.f32 %v4281_v19, %v4280_v46 }
 0x208   : > { %4018 = vmatmul.mubr.msk.bf16.gmra.mrb[60].mxu1 %vm6042_vm9, %v5831_v52 }
 0x20b   : > { %v4283_v16 = vpop.f32.mrb[52].mxu0 }
 0x20c   : > { %v4284_v49 = vpop.f32.mrb[53].mxu0 }
 0x20d   : > { %v6124_v51 = vadd.f32 %v4284_v49, %v4283_v16  ;;  %v4286_v25 = vpop.f32.mrb[54].mxu0 }
 0x20e   : > { %v4287_v5 = vpop.f32.mrb[55].mxu0 }
 0x20f   : > { %v6126_v48 = vadd.f32 %v4287_v5, %v4286_v25 }
 0x213   : > { %v4289_v54 = vpop.f32.mrb[56].mxu0 }
 0x214   : > { %v4290_v17 = vpop.f32.mrb[57].mxu0 }
 0x215   : > { %v6128_v61 = vadd.f32 %v4290_v17, %v4289_v54  ;;  %v4292_v27 = vpop.f32.mrb[58].mxu0 }
 0x216   : > { %v4293_v26 = vpop.f32.mrb[59].mxu0 }
 0x217   : > { %v6130_v34 = vadd.f32 %v4293_v26, %v4292_v27 }
 0x21b   : > { %v4295_v23 = vpop.f32.mrb[60].mxu0 }
 0x21c   : > { %v4296_v40 = vpop.f32.mrb[61].mxu0 }
 0x21d   : > { %v6132_v28 = vadd.f32 %v4296_v40, %v4295_v23  ;;  %v4298_v52 = vpop.f32.mrb[62].mxu0 }
 0x21e   : > { %v4299_v45 = vpop.f32.mrb[63].mxu0 }
 0x21f   : > { %v6134_v44 = vadd.f32 %v4299_v45, %v4298_v52 }
 0x223   : > { %v4301_v12 = vpop.f32.mrb[64].mxu0 }
 0x224   : > { %v4302_v55 = vpop.f32.mrb[65].mxu0 }
 0x225   : > { %v6136_v43 = vadd.f32 %v4302_v55, %v4301_v12  ;;  %v4304_v22 = vpop.f32.mrb[66].mxu0 }
 0x226   : > { %v4305_v47 = vpop.f32.mrb[67].mxu0 }
 0x227   : > { %v6138_v8 = vadd.f32 %v4305_v47, %v4304_v22 }
 0x22b   : > { %v4307_v24 = vpop.f32.mrb[68].mxu0 }
 0x22c   : > { %v4308_v14 = vpop.f32.mrb[69].mxu0 }
 0x22d   : > { %v6140_v2 = vadd.f32 %v4308_v14, %v4307_v24  ;;  %v4310_v58 = vpop.f32.mrb[70].mxu0  ;;  %v6172_v24 = vld [vmem:[%s6844_s4] ss:$0 sm:$0xff] }
 0x22e   : > { %v4311_v37 = vpop.f32.mrb[71].mxu0 }
 0x22f   : > { %v6142_v57 = vadd.f32 %v4311_v37, %v4310_v58 }
 0x233   : > { %v4313_v63 = vpop.f32.mrb[72].mxu0 }
 0x234   : > { %v4314_v10 = vpop.f32.mrb[73].mxu0 }
 0x235   : > { %v6144_v59 = vadd.f32 %v4314_v10, %v4313_v63  ;;  %v4316_v29 = vpop.f32.mrb[74].mxu0 }
 0x236   : > { %v4317_v38 = vpop.f32.mrb[75].mxu0 }
 0x237   : > { %v6146_v21 = vadd.f32 %v4317_v38, %v4316_v29 }
 0x23b   : > { %v4319_v39 = vpop.f32.mrb[76].mxu0 }
 0x23c   : > { %v4320_v56 = vpop.f32.mrb[77].mxu0 }
 0x23d   : > { %v6148_v50 = vadd.f32 %v4320_v56, %v4319_v39  ;;  %v4322_v9 = vpop.f32.mrb[78].mxu0 }
 0x23e   : > { %v4323_v3 = vpop.f32.mrb[79].mxu0 }
 0x23f   : > { %v6150_v42 = vadd.f32 %v4323_v3, %v4322_v9 }
 0x243   : > { %v4325_v15 = vpop.f32.mrb[80].mxu0 }
 0x244   : > { %v4326_v53 = vpop.f32.mrb[81].mxu0 }
 0x245   : > { %v6152_v1 = vadd.f32 %v4326_v53, %v4325_v15  ;;  %v4328_v32 = vpop.f32.mrb[82].mxu0 }
 0x246   : > { %v4329_v30 = vpop.f32.mrb[83].mxu0 }
 0x247   : > { %v6154_v13 = vadd.f32 %v4329_v30, %v4328_v32 }
 0x24b   : > { %v4331_v36 = vpop.f32.mrb[84].mxu0 }
 0x24c   : > { %v4332_v0 = vpop.f32.mrb[85].mxu0 }
 0x24d   : > { %v6156_v41 = vadd.f32 %v4332_v0, %v4331_v36  ;;  %v4334_v6 = vpop.f32.mrb[86].mxu0 }
 0x24e   : > { %v4335_v31 = vpop.f32.mrb[87].mxu0 }
 0x24f   : > { %v6158_v46 = vadd.f32 %v4335_v31, %v4334_v6 }
 0x253   : > { %v4337_v19 = vpop.f32.mrb[88].mxu0 }
 0x254   : > { %v4338_v16 = vpop.f32.mrb[89].mxu0 }
 0x255   : > { %v6160_v49 = vadd.f32 %v4338_v16, %v4337_v19  ;;  %v4340_v25 = vpop.f32.mrb[90].mxu0 }
 0x256   : > { %v4341_v5 = vpop.f32.mrb[91].mxu0 }
 0x257   : > { %v6162_v54 = vadd.f32 %v4341_v5, %v4340_v25 }
 0x25b   : > { %v4343_v17 = vpop.f32.mrb[92].mxu0 }
 0x25c   : > { %v4344_v27 = vpop.f32.mrb[93].mxu0 }
 0x25d   : > { %v6164_v26 = vadd.f32 %v4344_v27, %v4343_v17  ;;  %v4346_v23 = vpop.f32.mrb[94].mxu0 }
 0x25e   : > { %v4347_v40 = vpop.f32.mrb[95].mxu0 }
 0x25f   : > { %v6166_v52 = vadd.f32 %v4347_v40, %v4346_v23 }
 0x263   : > { %v2430_v45 = vpop.f32.mrb[0].mxu1  ;;  %v4481_v12 = vpop.f32.mrb[96].mxu0 }
 0x264   : > { %v2787_v55 = vadd.f32 %v4481_v12, %v6084_v18  ;;  %v2432_v22 = vpop.f32.mrb[1].mxu1  ;;  %v2780_v47 = vpop.f32.mrb[97].mxu0 }
 0x265   : > { %v2434_v14 = vpop.f32.mrb[2].mxu1  ;;  %v4482_v58 = vpop.f32.mrb[98].mxu0 }
 0x266   : > { %v2937_v37 = vadd.f32 %v2787_v55, %v2432_v22  ;;  %v2790_v63 = vadd.f32 %v4482_v58, %v6089_v60  ;;  %v2436_v10 = vpop.f32.mrb[3].mxu1  ;;  %v2782_v29 = vpop.f32.mrb[99].mxu0 }
 0x268   : > { %v2976_v38 = vadd.f32 %v6172_v24, %v2937_v37  ;;  %v2938_v39 = vadd.f32 %v2790_v63, %v2436_v10 }
 0x26a   : > { %v2977_v56 = vadd.f32 %v6172_v24, %v2938_v39  ;;  %v3008_v3 = vmax.f32 %v2976_v38, 0.0 }
 0x26b   : > { %v2440_v18 = vpop.f32.mrb[4].mxu1  ;;  %v4485_v9 = vpop.f32.mrb[100].mxu0 }
 0x26c   : > { %v3009_v15 = vmax.f32 %v2977_v56, 0.0  ;;  %v2803_v53 = vadd.f32 %v4485_v9, %v6109_v33  ;;  %v2442_v32 = vpop.f32.mrb[5].mxu1  ;;  %v2794_v30 = vpop.f32.mrb[101].mxu0 }
 0x26d   : > { %v2907_v36 = vadd.f32 %v2442_v32, %v2430_v45  ;;  %v2795_v0 = vadd.f32 %v6098_v35, %v2794_v30  ;;  %v2444_v6 = vpop.f32.mrb[6].mxu1  ;;  %v4486_v60 = vpop.f32.mrb[102].mxu0 }
 0x26e   : > { %v2806_v31 = vadd.f32 %v4486_v60, %v6111_v7  ;;  %v2446_v19 = vpop.f32.mrb[7].mxu1  ;;  %v2797_v16 = vpop.f32.mrb[103].mxu0  ;;  %v3040_v25 = vpack.c.bf16 %v3009_v15, %v3008_v3 }
 0x26f   : > { %v2939_v5 = vadd.f32 %v2907_v36, %v2795_v0  ;;  %v2908_v17 = vadd.f32 %v2446_v19, %v2434_v14  ;;  %v2798_v27 = vadd.f32 %v6103_v4, %v2797_v16 }
 0x270   : > { %4527 = vmatprep.mubr.bf16.mxu0 %v3040_v25 }
 0x271   : > { %v2978_v23 = vadd.f32 %v6172_v24, %v2939_v5  ;;  %v2940_v33 = vadd.f32 %v2908_v17, %v2798_v27 }
 0x273   : > { %v2979_v40 = vadd.f32 %v6172_v24, %v2940_v33  ;;  %v2450_v45 = vpop.f32.mrb[8].mxu1  ;;  %v4489_v12 = vpop.f32.mrb[104].mxu0  ;;  %v3010_v7 = vmax.f32 %v2978_v23, 0.0 }
 0x274   : > { %v2819_v35 = vadd.f32 %v4489_v12, %v6124_v51  ;;  %v2452_v55 = vpop.f32.mrb[9].mxu1  ;;  %v2810_v22 = vpop.f32.mrb[105].mxu0 }
 0x275   : > { %v3011_v47 = vmax.f32 %v2979_v40, 0.0  ;;  %v2909_v58 = vadd.f32 %v2452_v55, %v2440_v18  ;;  %v2811_v37 = vadd.f32 %v6117_v20, %v2810_v22  ;;  %v2454_v14 = vpop.f32.mrb[10].mxu1  ;;  %v4490_v63 = vpop.f32.mrb[106].mxu0 }
 0x276   : > { %v2822_v4 = vadd.f32 %v4490_v63, %v6126_v48  ;;  %v2456_v10 = vpop.f32.mrb[11].mxu1  ;;  %v2813_v29 = vpop.f32.mrb[107].mxu0 }
 0x277   : > { %v3041_v38 = vpack.c.bf16 %v3011_v47, %v3010_v7  ;;  %v2941_v39 = vadd.f32 %v2909_v58, %v2803_v53  ;;  %v2910_v56 = vadd.f32 %v2456_v10, %v2444_v6  ;;  %v2814_v9 = vadd.f32 %v6119_v62, %v2813_v29 }
 0x279   : > { %v2980_v51 = vadd.f32 %v6172_v24, %v2941_v39  ;;  %v2942_v3 = vadd.f32 %v2910_v56, %v2806_v31  ;;  %4528 = vmatmul.mubr.bf16.vlgmr.msra.gmra.mrb[128].mxu0 %v3041_v38 }
 0x27b   : > { %v2981_v15 = vadd.f32 %v6172_v24, %v2942_v3  ;;  %v2460_v18 = vpop.f32.mrb[12].mxu1  ;;  %v4493_v32 = vpop.f32.mrb[108].mxu0  ;;  %v3012_v36 = vmax.f32 %v2980_v51, 0.0 }
 0x27c   : > { %v6190_v20 = vadd.f32 %v4493_v32, %v6132_v28  ;;  %v2462_v30 = vpop.f32.mrb[13].mxu1  ;;  %v2826_v48 = vpop.f32.mrb[109].mxu0 }
 0x27d   : > { %v3013_v0 = vmax.f32 %v2981_v15, 0.0  ;;  %v2911_v60 = vadd.f32 %v2462_v30, %v2450_v45  ;;  %v2827_v53 = vadd.f32 %v6128_v61, %v2826_v48  ;;  %v2464_v6 = vpop.f32.mrb[14].mxu1  ;;  %v4494_v62 = vpop.f32.mrb[110].mxu0 }
 0x27e   : > { %v6194_v19 = vadd.f32 %v4494_v62, %v6134_v44  ;;  %v2466_v31 = vpop.f32.mrb[15].mxu1  ;;  %v2829_v16 = vpop.f32.mrb[111].mxu0 }
 0x27f   : > { %v2943_v25 = vadd.f32 %v2911_v60, %v2811_v37  ;;  %v2912_v5 = vadd.f32 %v2466_v31, %v2454_v14  ;;  %v2830_v17 = vadd.f32 %v6130_v34, %v2829_v16  ;;  %v3042_v28 = vpack.c.bf16 %v3013_v0, %v3012_v36 }
 0x281   : > { %v2982_v27 = vadd.f32 %v6172_v24, %v2943_v25  ;;  %v2944_v23 = vadd.f32 %v2912_v5, %v2814_v9  ;;  %4531 = vmatprep.mubr.bf16.mxu0 %v3042_v28 }
 0x283   : > { %v2983_v33 = vadd.f32 %v6172_v24, %v2944_v23  ;;  %v2470_v40 = vpop.f32.mrb[16].mxu1  ;;  %v4497_v61 = vpop.f32.mrb[112].mxu0  ;;  %v3014_v55 = vmax.f32 %v2982_v27, 0.0 }
 0x284   : > { %v6200_v45 = vadd.f32 %v4497_v61, %v6140_v2  ;;  %v2472_v44 = vpop.f32.mrb[17].mxu1  ;;  %v2842_v12 = vpop.f32.mrb[113].mxu0 }
 0x285   : > { %v3015_v22 = vmax.f32 %v2983_v33, 0.0  ;;  %v2913_v7 = vadd.f32 %v2472_v44, %v2460_v18  ;;  %v6203_v47 = vadd.f32 %v6136_v43, %v2842_v12  ;;  %v2474_v34 = vpop.f32.mrb[18].mxu1  ;;  %v4498_v58 = vpop.f32.mrb[114].mxu0 }
 0x286   : > { %v6206_v37 = vadd.f32 %v4498_v58, %v6142_v57  ;;  %v2476_v14 = vpop.f32.mrb[19].mxu1  ;;  %v2845_v63 = vpop.f32.mrb[115].mxu0 }
 0x287   : > { %v2945_v10 = vadd.f32 %v2913_v7, %v2819_v35  ;;  %v2914_v29 = vadd.f32 %v2476_v14, %v2464_v6  ;;  %v6209_v2 = vadd.f32 %v6138_v8, %v2845_v63  ;;  %v3043_v38 = vpack.c.bf16 %v3015_v22, %v3014_v55 }
 0x289   : > { %v2984_v39 = vadd.f32 %v6172_v24, %v2945_v10  ;;  %v2946_v56 = vadd.f32 %v2914_v29, %v2822_v4  ;;  %4532 = vmatmul.mubr.bf16.gmra.mrb[132].mxu0 %v3043_v38 }
 0x28b   : > { %v2985_v43 = vadd.f32 %v6172_v24, %v2946_v56  ;;  %v2480_v9 = vpop.f32.mrb[20].mxu1  ;;  %v4501_v51 = vpop.f32.mrb[116].mxu0  ;;  %v3016_v18 = vmax.f32 %v2984_v39, 0.0 }
 0x28c   : > { %v6214_v3 = vadd.f32 %v4501_v51, %v6148_v50  ;;  %v2482_v57 = vpop.f32.mrb[21].mxu1  ;;  %v2858_v15 = vpop.f32.mrb[117].mxu0 }
 0x28d   : > { %v3017_v35 = vmax.f32 %v2985_v43, 0.0  ;;  %v2915_v32 = vadd.f32 %v2482_v57, %v2470_v40  ;;  %v6217_v8 = vadd.f32 %v6144_v59, %v2858_v15  ;;  %v2484_v30 = vpop.f32.mrb[22].mxu1  ;;  %v4502_v48 = vpop.f32.mrb[118].mxu0 }
 0x28e   : > { %v6220_v4 = vadd.f32 %v4502_v48, %v6150_v42  ;;  %v2486_v36 = vpop.f32.mrb[23].mxu1  ;;  %v2861_v0 = vpop.f32.mrb[119].mxu0 }
 0x28f   : > { %v2947_v60 = vadd.f32 %v2915_v32, %v2827_v53  ;;  %v2916_v6 = vadd.f32 %v2486_v36, %v2474_v34  ;;  %v6223_v50 = vadd.f32 %v6146_v21, %v2861_v0  ;;  %v3044_v62 = vpack.c.bf16 %v3017_v35, %v3016_v18 }
 0x291   : > { %v2986_v31 = vadd.f32 %v6172_v24, %v2947_v60  ;;  %v2948_v16 = vadd.f32 %v2916_v6, %v2830_v17  ;;  %4535 = vmatprep.mubr.bf16.mxu0 %v3044_v62 }
 0x293   : > { %v2987_v59 = vadd.f32 %v6172_v24, %v2948_v16  ;;  %v2490_v25 = vpop.f32.mrb[24].mxu1  ;;  %v4505_v5 = vpop.f32.mrb[120].mxu0  ;;  %v3018_v23 = vmax.f32 %v2986_v31, 0.0 }
 0x294   : > { %v6228_v28 = vadd.f32 %v4505_v5, %v6156_v41  ;;  %v2492_v42 = vpop.f32.mrb[25].mxu1  ;;  %v2874_v27 = vpop.f32.mrb[121].mxu0 }
 0x295   : > { %v3019_v53 = vmax.f32 %v2987_v59, 0.0  ;;  %v2917_v33 = vadd.f32 %v2492_v42, %v2480_v9  ;;  %v6231_v21 = vadd.f32 %v6152_v1, %v2874_v27  ;;  %v2494_v40 = vpop.f32.mrb[26].mxu1  ;;  %v4506_v61 = vpop.f32.mrb[122].mxu0 }
 0x296   : > { %v6234_v17 = vadd.f32 %v4506_v61, %v6158_v46  ;;  %v2496_v44 = vpop.f32.mrb[27].mxu1  ;;  %v2877_v12 = vpop.f32.mrb[123].mxu0 }
 0x297   : > { %v2949_v55 = vadd.f32 %v2917_v33, %v6190_v20  ;;  %v2918_v22 = vadd.f32 %v2496_v44, %v2484_v30  ;;  %v6238_v41 = vadd.f32 %v6154_v13, %v2877_v12  ;;  %v3045_v7 = vpack.c.bf16 %v3019_v53, %v3018_v23 }
 0x299   : > { %v2988_v34 = vadd.f32 %v6172_v24, %v2949_v55  ;;  %v2950_v58 = vadd.f32 %v2918_v22, %v6194_v19  ;;  %4536 = vmatmul.mubr.bf16.gmra.mrb[136].mxu0 %v3045_v7 }
 0x29b   : > { %v2989_v1 = vadd.f32 %v6172_v24, %v2950_v58  ;;  %v2500_v14 = vpop.f32.mrb[28].mxu1  ;;  %v4509_v63 = vpop.f32.mrb[124].mxu0  ;;  %v3020_v20 = vmax.f32 %v2988_v34, 0.0 }
 0x29c   : > { %v6244_v46 = vadd.f32 %v4509_v63, %v6164_v26  ;;  %v2502_v10 = vpop.f32.mrb[29].mxu1  ;;  %v2890_v29 = vpop.f32.mrb[125].mxu0 }
 0x29d   : > { %v3021_v38 = vmax.f32 %v2989_v1, 0.0  ;;  %v2919_v39 = vadd.f32 %v2502_v10, %v2490_v25  ;;  %v6247_v13 = vadd.f32 %v6160_v49, %v2890_v29  ;;  %v2504_v56 = vpop.f32.mrb[30].mxu1  ;;  %v4510_v43 = vpop.f32.mrb[126].mxu0 }
 0x29e   : > { %v6250_v19 = vadd.f32 %v4510_v43, %v6166_v52  ;;  %v2506_v9 = vpop.f32.mrb[31].mxu1  ;;  %v2893_v51 = vpop.f32.mrb[127].mxu0 }
 0x29f   : > { %v2951_v57 = vadd.f32 %v2919_v39, %v6203_v47  ;;  %v2920_v15 = vadd.f32 %v2506_v9, %v2494_v40  ;;  %v6254_v26 = vadd.f32 %v6162_v54, %v2893_v51  ;;  %v3046_v18 = vpack.c.bf16 %v3021_v38, %v3020_v20 }
 0x2a1   : > { %v2990_v35 = vadd.f32 %v6172_v24, %v2951_v57  ;;  %v2952_v32 = vadd.f32 %v2920_v15, %v6209_v2  ;;  %4539 = vmatprep.mubr.bf16.mxu0 %v3046_v18 }
 0x2a3   : > { %v2991_v49 = vadd.f32 %v6172_v24, %v2952_v32  ;;  %v2510_v30 = vpop.f32.mrb[32].mxu1  ;;  %v3022_v52 = vmax.f32 %v2990_v35, 0.0 }
 0x2a4   : > { %v2512_v48 = vpop.f32.mrb[33].mxu1 }
 0x2a5   : > { %v3023_v36 = vmax.f32 %v2991_v49, 0.0  ;;  %v2921_v0 = vadd.f32 %v2512_v48, %v2500_v14  ;;  %v2514_v60 = vpop.f32.mrb[34].mxu1 }
 0x2a6   : > { %v2516_v6 = vpop.f32.mrb[35].mxu1 }
 0x2a7   : > { %v2953_v47 = vadd.f32 %v2921_v0, %v6200_v45  ;;  %v2922_v62 = vadd.f32 %v2516_v6, %v2504_v56  ;;  %v3047_v54 = vpack.c.bf16 %v3023_v36, %v3022_v52 }
 0x2a9   : > { %v2992_v31 = vadd.f32 %v6172_v24, %v2953_v47  ;;  %v2954_v16 = vadd.f32 %v2922_v62, %v6206_v37  ;;  %4540 = vmatmul.mubr.bf16.gmra.mrb[140].mxu0 %v3047_v54 }
 0x2ab   : > { %v2993_v2 = vadd.f32 %v6172_v24, %v2954_v16  ;;  %v2520_v59 = vpop.f32.mrb[36].mxu1  ;;  %v3024_v5 = vmax.f32 %v2992_v31, 0.0 }
 0x2ac   : > { %v2522_v25 = vpop.f32.mrb[37].mxu1 }
 0x2ad   : > { %v3025_v42 = vmax.f32 %v2993_v2, 0.0  ;;  %v2923_v27 = vadd.f32 %v2522_v25, %v2510_v30  ;;  %v2524_v23 = vpop.f32.mrb[38].mxu1 }
 0x2ae   : > { %v2526_v53 = vpop.f32.mrb[39].mxu1 }
 0x2af   : > { %v2955_v33 = vadd.f32 %v2923_v27, %v6217_v8  ;;  %v2924_v40 = vadd.f32 %v2526_v53, %v2514_v60  ;;  %v3048_v45 = vpack.c.bf16 %v3025_v42, %v3024_v5 }
 0x2b1   : > { %v2994_v61 = vadd.f32 %v6172_v24, %v2955_v33  ;;  %v2956_v44 = vadd.f32 %v2924_v40, %v6223_v50  ;;  %4543 = vmatprep.mubr.bf16.mxu0 %v3048_v45  ;;  %v4836_v45 = vld [vmem:[%s6847_s7] sm:$0xff]  }
 0x2b3   : > { %v2995_v37 = vadd.f32 %v6172_v24, %v2956_v44  ;;  %v2530_v12 = vpop.f32.mrb[40].mxu1  ;;  %v3026_v22 = vmax.f32 %v2994_v61, 0.0 }
 0x2b4   : > { %v2532_v55 = vpop.f32.mrb[41].mxu1 }
 0x2b5   : > { %v3027_v7 = vmax.f32 %v2995_v37, 0.0  ;;  %v2925_v34 = vadd.f32 %v2532_v55, %v2520_v59  ;;  %v2534_v58 = vpop.f32.mrb[42].mxu1 }
 0x2b6   : > { %v2536_v1 = vpop.f32.mrb[43].mxu1 }
 0x2b7   : > { %v2957_v14 = vadd.f32 %v2925_v34, %v6214_v3  ;;  %v2926_v63 = vadd.f32 %v2536_v1, %v2524_v23  ;;  %v3049_v8 = vpack.c.bf16 %v3027_v7, %v3026_v22 }
 0x2b9   : > { %v2996_v10 = vadd.f32 %v6172_v24, %v2957_v14  ;;  %v2958_v29 = vadd.f32 %v2926_v63, %v6220_v4  ;;  %4544 = vmatmul.mubr.bf16.gmra.mrb[144].mxu0 %v3049_v8 }
 0x2bb   : > { %v2997_v50 = vadd.f32 %v6172_v24, %v2958_v29  ;;  %v2540_v20 = vpop.f32.mrb[44].mxu1  ;;  %v3028_v39 = vmax.f32 %v2996_v10, 0.0 }
 0x2bc   : > { %v2542_v38 = vpop.f32.mrb[45].mxu1 }
 0x2bd   : > { %v3029_v56 = vmax.f32 %v2997_v50, 0.0  ;;  %v2927_v43 = vadd.f32 %v2542_v38, %v2530_v12  ;;  %v2544_v9 = vpop.f32.mrb[46].mxu1 }
 0x2be   : > { %v2546_v51 = vpop.f32.mrb[47].mxu1 }
 0x2bf   : > { %v2959_v57 = vadd.f32 %v2927_v43, %v6231_v21  ;;  %v2928_v15 = vadd.f32 %v2546_v51, %v2534_v58  ;;  %v3050_v3 = vpack.c.bf16 %v3029_v56, %v3028_v39 }
 0x2c1   : > { %v2998_v18 = vadd.f32 %v6172_v24, %v2959_v57  ;;  %v2960_v35 = vadd.f32 %v2928_v15, %v6238_v41  ;;  %4547 = vmatprep.mubr.bf16.mxu0 %v3050_v3  ;;  %v4838_v57 = vld [vmem:[%s6847_s7 + $0x10] sm:$0xff]   ;;  %v4840_v15 = vld [vmem:[%s6847_s7 + $0x20] sm:$0xff]   ;;  %v4841_v3 = vld [vmem:[%s6847_s7 + $0x28] sm:$0xff]  }
 0x2c3   : > { %v2999_v4 = vadd.f32 %v6172_v24, %v2960_v35  ;;  %v2550_v32 = vpop.f32.mrb[48].mxu1  ;;  %v3030_v30 = vmax.f32 %v2998_v18, 0.0  ;;  %v4842_v18 = vld [vmem:[%s6847_s7 + $0x30] sm:$0xff]  }
 0x2c4   : > { %v2552_v49 = vpop.f32.mrb[49].mxu1 }
 0x2c5   : > { %v3031_v48 = vmax.f32 %v2999_v4, 0.0  ;;  %v2929_v52 = vadd.f32 %v2552_v49, %v2540_v20  ;;  %v2554_v36 = vpop.f32.mrb[50].mxu1 }
 0x2c6   : > { %v2556_v0 = vpop.f32.mrb[51].mxu1 }
 0x2c7   : > { %v2961_v60 = vadd.f32 %v2929_v52, %v6228_v28  ;;  %v2930_v6 = vadd.f32 %v2556_v0, %v2544_v9  ;;  %v3051_v21 = vpack.c.bf16 %v3031_v48, %v3030_v30  ;;  %v4843_v30 = vld [vmem:[%s6847_s7 + $0x38] sm:$0xff]   ;;  %v4844_v48 = vld [vmem:[%s6849_s9] sm:$0xff]   ;;  %v4845_v52 = vld [vmem:[%s6849_s9 + $0x8] sm:$0xff]  }
 0x2c9   : > { %v3000_v47 = vadd.f32 %v6172_v24, %v2961_v60  ;;  %v2962_v62 = vadd.f32 %v2930_v6, %v6234_v17  ;;  %4548 = vmatmul.mubr.bf16.gmra.mrb[148].mxu0 %v3051_v21  ;;  %v4846_v6 = vld [vmem:[%s6849_s9 + $0x10] sm:$0xff]  }
 0x2cb   : > { %v3001_v41 = vadd.f32 %v6172_v24, %v2962_v62  ;;  %v2560_v54 = vpop.f32.mrb[52].mxu1  ;;  %v3032_v16 = vmax.f32 %v3000_v47, 0.0 }
 0x2cc   : > { %v2562_v31 = vpop.f32.mrb[53].mxu1 }
 0x2cd   : > { %v3033_v2 = vmax.f32 %v3001_v41, 0.0  ;;  %v2931_v59 = vadd.f32 %v2562_v31, %v2550_v32  ;;  %v2564_v25 = vpop.f32.mrb[54].mxu1  ;;  %v4847_v31 = vld [vmem:[%s6849_s9 + $0x18] sm:$0xff]  }
 0x2ce   : > { %v2566_v5 = vpop.f32.mrb[55].mxu1 }
 0x2cf   : > { %v2963_v42 = vadd.f32 %v2931_v59, %v6247_v13  ;;  %v2932_v27 = vadd.f32 %v2566_v5, %v2554_v36  ;;  %v3052_v28 = vpack.c.bf16 %v3033_v2, %v3032_v16  ;;  %v4954_v13 = vmov 0.0   ;;  %v6334_v36 = vld [vmem:[%s6846_s6] ss:$0 sm:$0xff] }
 0x2d0   : > { %4559 = vmatprep.subr.bf16.mxu1 %v4954_v13  ;;  %4579 = vmatprep.subr.bf16.mxu0 %v4954_v13  ;;  %v4848_v59 = vld [vmem:[%s6849_s9 + $0x20] sm:$0xff]  }
 0x2d1   : > { %v3002_v23 = vadd.f32 %v6172_v24, %v2963_v42  ;;  %v2964_v53 = vadd.f32 %v2932_v27, %v6254_v26  ;;  %4551 = vmatprep.mubr.bf16.mxu0 %v3052_v28  ;;  %4560 = vmatpush3.bf16.msra.mxu1 %v4836_v45  ;;  %v4849_v27 = vld [vmem:[%s6849_s9 + $0x28] sm:$0xff]  }
 0x2d2   : > { %4561 = vmatprep.subr.bf16.mxu1 %v4954_v13  ;;  %4575 = vmatprep.mubr.msk.bf16.mxu1 %vm4955_vm3, %v4954_v13 }
 0x2d3   : > { %v3003_v17 = vadd.f32 %v6172_v24, %v2964_v53  ;;  %v2570_v33 = vpop.f32.mrb[56].mxu1  ;;  %v3034_v61 = vmax.f32 %v3002_v23, 0.0  ;;  %4580 = vmatpush3.bf16.msra.mxu0 %v4844_v48 }
 0x2d4   : > { %v2572_v40 = vpop.f32.mrb[57].mxu1  ;;  %4581 = vmatprep.subr.bf16.mxu0 %v4954_v13 }
 0x2d5   : > { %v3035_v44 = vmax.f32 %v3003_v17, 0.0  ;;  %v2933_v37 = vadd.f32 %v2572_v40, %v2560_v54  ;;  %v2574_v12 = vpop.f32.mrb[58].mxu1  ;;  %v4850_v17 = vld [vmem:[%s6849_s9 + $0x30] sm:$0xff]  }
 0x2d6   : > { %v2576_v55 = vpop.f32.mrb[59].mxu1 }
 0x2d7   : > { %v2965_v26 = vadd.f32 %v2933_v37, %v6244_v46  ;;  %v2934_v22 = vadd.f32 %v2576_v55, %v2564_v25  ;;  %v3053_v7 = vpack.c.bf16 %v3035_v44, %v3034_v61  ;;  %4582 = vmatpush3.bf16.msra.mxu0 %v4845_v52  ;;  %v4851_v37 = vld [vmem:[%s6849_s9 + $0x38] sm:$0xff]  }
 0x2d8   : > { %4583 = vmatprep.subr.bf16.mxu0 %v4954_v13 }
 0x2d9   : > { %v3004_v34 = vadd.f32 %v6172_v24, %v2965_v26  ;;  %v2966_v58 = vadd.f32 %v2934_v22, %v6250_v19  ;;  %4552 = vmatmul.mubr.bf16.gmra.mrb[152].mxu0 %v3053_v7  ;;  %v4837_v19 = vld [vmem:[%s6847_s7 + $0x8] sm:$0xff]  }
 0x2da   : > { %4562 = vmatpush3.bf16.msra.mxu1 %v4837_v19 }
 0x2db   : > { %v3005_v1 = vadd.f32 %v6172_v24, %v2966_v58  ;;  %v2580_v14 = vpop.f32.mrb[60].mxu1  ;;  %v3036_v8 = vmax.f32 %v3004_v34, 0.0  ;;  %4563 = vmatprep.subr.bf16.mxu1 %v4954_v13  ;;  %4584 = vmatpush3.bf16.msra.mxu0 %v4846_v6 }
 0x2dc   : > { %v2581_v63 = vpop.f32.mrb[61].mxu1  ;;  %4585 = vmatprep.subr.bf16.mxu0 %v4954_v13 }
 0x2dd   : > { %v3037_v10 = vmax.f32 %v3005_v1, 0.0  ;;  %v2935_v29 = vadd.f32 %v2581_v63, %v2570_v33  ;;  %v2583_v50 = vpop.f32.mrb[62].mxu1 }
 0x2de   : > { %v2584_v20 = vpop.f32.mrb[63].mxu1  ;;  %4564 = vmatpush3.bf16.msra.mxu1 %v4838_v57 }
 0x2df   : > { %v3006_v46 = vadd.f32 %v6172_v24, %v2935_v29  ;;  %v2936_v38 = vadd.f32 %v2584_v20, %v2574_v12  ;;  %v3054_v39 = vpack.c.bf16 %v3037_v10, %v3036_v8  ;;  %4565 = vmatprep.subr.bf16.mxu1 %v4954_v13  ;;  %4586 = vmatpush3.bf16.msra.mxu0 %v4847_v31 }
 0x2e0   : > { %4587 = vmatprep.subr.bf16.mxu0 %v4954_v13 }
 0x2e1   : > { %v3007_v56 = vadd.f32 %v6172_v24, %v2936_v38  ;;  %4555 = vmatprep.mubr.bf16.mxu0 %v3054_v39  ;;  %v3038_v43 = vmax.f32 %v3006_v46, 0.0  ;;  %v4839_v24 = vld [vmem:[%s6847_s7 + $0x18] sm:$0xff]  }
 0x2e2   : > { %4566 = vmatpush3.bf16.msra.mxu1 %v4839_v24 }
 0x2e3   : > { %v3039_v9 = vmax.f32 %v3007_v56, 0.0  ;;  %4567 = vmatprep.subr.bf16.mxu1 %v4954_v13  ;;  %4588 = vmatpush3.bf16.msra.mxu0 %v4848_v59 }
 0x2e4   : > { %4589 = vmatprep.subr.bf16.mxu0 %v4954_v13 }
 0x2e5   : > { %v3055_v51 = vpack.c.bf16 %v3039_v9, %v3038_v43 }
 0x2e6   : > { %4568 = vmatpush3.bf16.msra.mxu1 %v4840_v15 }
 0x2e7   : > { %4556 = vmatmul.mubr.bf16.gmra.mrb[156].mxu0 %v3055_v51  ;;  %4569 = vmatprep.subr.bf16.mxu1 %v4954_v13 }
 0x2e8   : > { %4595 = vmatprep.mubr.msk.bf16.mxu0 %vm4955_vm3, %v4954_v13  ;;  %4590 = vmatpush3.bf16.msra.mxu0 %v4849_v27 }
 0x2e9   : > { %4591 = vmatprep.subr.bf16.mxu0 %v4954_v13 }
 0x2ea   : > { %4570 = vmatpush3.bf16.msra.mxu1 %v4841_v3 }
 0x2eb   : > { %4571 = vmatprep.subr.bf16.mxu1 %v4954_v13 }
 0x2ec   : > { %4592 = vmatpush3.bf16.msra.mxu0 %v4850_v17 }
 0x2ed   : > { %4593 = vmatprep.subr.bf16.mxu0 %v4954_v13 }
 0x2ee   : > { %4572 = vmatpush3.bf16.msra.mxu1 %v4842_v18 }
 0x2ef   : > { %4573 = vmatprep.subr.bf16.mxu1 %v4954_v13 }
 0x2f0   : > { %4594 = vmatpush3.bf16.msra.mxu0 %v4851_v37 }
 0x2f2   : > { %4574 = vmatpush3.bf16.msra.mxu1 %v4843_v30 }
 0x34c   : > { %v4529_v35 = vpop.f32.mrb[128].mxu0 }
 0x34d   : > { %v3161_v4 = vpop.f32.mrb[129].mxu0  ;;  %v6353_v16 = vadd.f32 %v4529_v35, %v6334_v36 }
 0x34e   : > { %v4530_v32 = vpop.f32.mrb[130].mxu0  ;;  %v6344_v47 = vadd.f32 %v6334_v36, %v3161_v4 }
 0x34f   : > { %v3164_v49 = vpop.f32.mrb[131].mxu0  ;;  %v6361_v25 = vadd.f32 %v4530_v32, %v6334_v36 }
 0x350   : > { %v6337_v0 = vadd.f32 %v6334_v36, %v3164_v49 }
 0x352   : > { %v3288_v54 = vadd.f32 %v6337_v0, %v6344_v47 }
 0x354   : > { %v3289_v2 = vadd.f32 %v3288_v54, %v6353_v16 }
 0x356   : > { %v3290_v42 = vadd.f32 %v3289_v2, %v6361_v25 }
 0x35c   : > { %v4533_v60 = vpop.f32.mrb[132].mxu0 }
 0x35d   : > { %v3177_v21 = vpop.f32.mrb[133].mxu0  ;;  %v6381_v44 = vadd.f32 %v4533_v60, %v6334_v36 }
 0x35e   : > { %v4534_v62 = vpop.f32.mrb[134].mxu0  ;;  %v6364_v5 = vadd.f32 %v6334_v36, %v3177_v21 }
 0x35f   : > { %v3180_v41 = vpop.f32.mrb[135].mxu0  ;;  %v6389_v55 = vadd.f32 %v4534_v62, %v6334_v36 }
 0x360   : > { %v3291_v28 = vadd.f32 %v3290_v42, %v6364_v5  ;;  %v6373_v23 = vadd.f32 %v6334_v36, %v3180_v41 }
 0x362   : > { %v3292_v40 = vadd.f32 %v3291_v28, %v6373_v23 }
 0x364   : > { %v3293_v12 = vadd.f32 %v3292_v40, %v6381_v44 }
 0x366   : > { %v3294_v22 = vadd.f32 %v3293_v12, %v6389_v55 }
 0x36c   : > { %v4537_v53 = vpop.f32.mrb[136].mxu0 }
 0x36d   : > { %v3193_v33 = vpop.f32.mrb[137].mxu0  ;;  %v6401_v14 = vadd.f32 %v4537_v53, %v6334_v36 }
 0x36e   : > { %v4538_v45 = vpop.f32.mrb[138].mxu0  ;;  %v6392_v26 = vadd.f32 %v6334_v36, %v3193_v33 }
 0x36f   : > { %v3196_v61 = vpop.f32.mrb[139].mxu0  ;;  %v6405_v29 = vadd.f32 %v4538_v45, %v6334_v36 }
 0x370   : > { %v3295_v7 = vadd.f32 %v3294_v22, %v6392_v26  ;;  %v6397_v34 = vadd.f32 %v6334_v36, %v3196_v61 }
 0x372   : > { %v3296_v58 = vadd.f32 %v3295_v7, %v6397_v34 }
 0x374   : > { %v3297_v10 = vadd.f32 %v3296_v58, %v6401_v14 }
 0x376   : > { %v3298_v20 = vadd.f32 %v3297_v10, %v6405_v29 }
 0x37c   : > { %v4541_v1 = vpop.f32.mrb[140].mxu0 }
 0x37d   : > { %v3209_v13 = vpop.f32.mrb[141].mxu0  ;;  %v6417_v56 = vadd.f32 %v4541_v1, %v6334_v36 }
 0x37e   : > { %v4542_v63 = vpop.f32.mrb[142].mxu0  ;;  %v6408_v50 = vadd.f32 %v6334_v36, %v3209_v13 }
 0x37f   : > { %v3212_v8 = vpop.f32.mrb[143].mxu0  ;;  %v6421_v24 = vadd.f32 %v4542_v63, %v6334_v36 }
 0x380   : > { %v3299_v46 = vadd.f32 %v3298_v20, %v6408_v50  ;;  %v6413_v38 = vadd.f32 %v6334_v36, %v3212_v8 }
 0x382   : > { %v3300_v39 = vadd.f32 %v3299_v46, %v6413_v38 }
 0x384   : > { %v3301_v19 = vadd.f32 %v3300_v39, %v6417_v56 }
 0x386   : > { %v3302_v3 = vadd.f32 %v3301_v19, %v6421_v24 }
 0x38c   : > { %v4545_v43 = vpop.f32.mrb[144].mxu0 }
 0x38d   : > { %v3225_v9 = vpop.f32.mrb[145].mxu0  ;;  %v6433_v32 = vadd.f32 %v4545_v43, %v6334_v36 }
 0x38e   : > { %v4546_v51 = vpop.f32.mrb[146].mxu0  ;;  %v6424_v15 = vadd.f32 %v6334_v36, %v3225_v9 }
 0x38f   : > { %v3228_v57 = vpop.f32.mrb[147].mxu0  ;;  %v6437_v52 = vadd.f32 %v4546_v51, %v6334_v36 }
 0x390   : > { %v3303_v18 = vadd.f32 %v3302_v3, %v6424_v15  ;;  %v6429_v35 = vadd.f32 %v6334_v36, %v3228_v57 }
 0x392   : > { %v3304_v4 = vadd.f32 %v3303_v18, %v6429_v35 }
 0x394   : > { %v3305_v49 = vadd.f32 %v3304_v4, %v6433_v32 }
 0x396   : > { %v3306_v62 = vadd.f32 %v3305_v49, %v6437_v52 }
 0x39c   : > { %v4549_v30 = vpop.f32.mrb[148].mxu0 }
 0x39d   : > { %v3241_v48 = vpop.f32.mrb[149].mxu0  ;;  %v6449_v2 = vadd.f32 %v4549_v30, %v6334_v36 }
 0x39e   : > { %v6440_v60 = vadd.f32 %v6334_v36, %v3241_v48  ;;  %v4550_v6 = vpop.f32.mrb[150].mxu0 }
 0x39f   : > { %v3244_v21 = vpop.f32.mrb[151].mxu0  ;;  %v6453_v42 = vadd.f32 %v4550_v6, %v6334_v36 }
 0x3a0   : > { %v3307_v41 = vadd.f32 %v3306_v62, %v6440_v60  ;;  %v6445_v54 = vadd.f32 %v6334_v36, %v3244_v21  ;;  %v3344_v21 = vld [vmem:[%s6848_s8] sm:$0x1] }
 0x3a2   : > { %v3308_v31 = vadd.f32 %v3307_v41, %v6445_v54 }
 0x3a4   : > { %v3309_v59 = vadd.f32 %v3308_v31, %v6449_v2 }
 0x3a6   : > { %v3310_v17 = vadd.f32 %v3309_v59, %v6453_v42 }
 0x3ac   : > { %v4553_v27 = vpop.f32.mrb[152].mxu0 }
 0x3ad   : > { %v3257_v28 = vpop.f32.mrb[153].mxu0  ;;  %v6465_v12 = vadd.f32 %v4553_v27, %v6334_v36 }
 0x3ae   : > { %v6456_v53 = vadd.f32 %v6334_v36, %v3257_v28  ;;  %v4554_v33 = vpop.f32.mrb[154].mxu0 }
 0x3af   : > { %v3260_v40 = vpop.f32.mrb[155].mxu0  ;;  %v6469_v7 = vadd.f32 %v4554_v33, %v6334_v36 }
 0x3b0   : > { %v3311_v45 = vadd.f32 %v3310_v17, %v6456_v53  ;;  %v6461_v61 = vadd.f32 %v6334_v36, %v3260_v40  ;;  %v3451_v17 = vld [vmem:[%s6850_s10] sm:$0x1] }
 0x3b2   : > { %v3312_v37 = vadd.f32 %v3311_v45, %v6461_v61 }
 0x3b4   : > { %v3313_v22 = vadd.f32 %v3312_v37, %v6465_v12 }
 0x3b6   : > { %v3314_v63 = vadd.f32 %v3313_v22, %v6469_v7 }
 0x3ba   : > { %v4557_v58 = vpop.f32.mrb[156].mxu0 }
 0x3bb   : > { %v3273_v1 = vpop.f32.mrb[157].mxu0  ;;  %v6480_v39 = vadd.f32 %v4557_v58, %v6334_v36 }
 0x3bc   : > { %v6472_v13 = vadd.f32 %v6334_v36, %v3273_v1  ;;  %v4558_v8 = vpop.f32.mrb[158].mxu0 }
 0x3bd   : > { %v3276_v10 = vpop.f32.mrb[159].mxu0  ;;  %v6484_v9 = vadd.f32 %v4558_v8, %v6334_v36  ;;  %v6495_v8 = vld [vmem:[%s5081_s29] sm:$0xff]  }
 0x3be   : > { %v3315_v20 = vadd.f32 %v3314_v63, %v6472_v13  ;;  %v6477_v46 = vadd.f32 %v6334_v36, %v3276_v10  ;;  %v3582_v10 = vunpack.c.l.bf16 %v6495_v8 }
 0x3c0   : > { %v3316_v43 = vadd.f32 %v3315_v20, %v6477_v46  ;;  %v3583_v20 = vunpack.c.h.bf16 %v6495_v8 }
 0x3c2   : > { %v3317_v19 = vadd.f32 %v3316_v43, %v6480_v39  ;;  %v6500_v43 = vld [vmem:[%s5081_s29 + $0x8] sm:$0xff]  }
 0x3c4   : > { %v3318_v51 = vadd.f32 %v3317_v19, %v6484_v9  ;;  %v3584_v19 = vunpack.c.l.bf16 %v6500_v43 }
 0x3c6   : > { %v3319_v57 = vrot.slane %v3318_v51, 4 }
 0x3c8   : > { %v3320_v3 = vadd.f32 %v3319_v57, %v3318_v51  ;;  %v3585_v51 = vunpack.c.h.bf16 %v6500_v43  ;;  %v6505_v57 = vld [vmem:[%s5081_s29 + $0x10] sm:$0xff]  }
 0x3ca   : > { %v3321_v18 = vrot.slane %v3320_v3, 2 }
 0x3cc   : > { %v3322_v4 = vadd.f32 %v3321_v18, %v3320_v3  ;;  %v3586_v3 = vunpack.c.l.bf16 %v6505_v57 }
 0x3ce   : > { %v3323_v49 = vrot.slane %v3322_v4, 1 }
 0x3d0   : > { %v3324_v30 = vadd.f32 %v3323_v49, %v3322_v4  ;;  %v6510_v4 = vld [vmem:[%s5081_s29 + $0x18] sm:$0xff]  }
 0x3d2   : > { %v3326_v48 = vmul.f32 0.00390625, %v3324_v30 }
 0x3d4   : > { %v3327_v6 = vpack.c.bf16 %v3326_v48, %v3326_v48  ;;  %v6515_v48 = vld [vmem:[%s5081_s29 + $0x20] sm:$0xff]  }
 0x3d6   : > { %4576 = vmatmul.mubr.bf16.vlgmr.msra.gmra.mrb[64].mxu1 %v3327_v6 }
 0x4a9   : > { %v3427_v62 = vpop.f32.mrb[64].mxu1 }
 0x4aa   : > { %v3428_v36 = vadd.f32 %v3427_v62, %v3344_v21  ;;  %v4577_v41 = vpop.f32.mrb[65].mxu1  ;;  %v6520_v62 = vld [vmem:[%s5081_s29 + $0x28] sm:$0xff]  }
 0x4ab   : > { %v3430_v31 = vpop.f32.mrb[66].mxu1  ;;  %v6556_v41 = vld [vmem:[%s5081_s29 + $0x60] sm:$0xff]  }
 0x4ac   : > { %v3433_v59 = vmax.f32 %v3428_v36, 0.0  ;;  %v4578_v27 = vpop.f32.mrb[67].mxu1  ;;  %v6525_v31 = vld [vmem:[%s5081_s29 + $0x30] sm:$0xff]   ;;  %v6561_v36 = vld [vmem:[%s5081_s29 + $0x68] sm:$0xff]  }
 0x4ad   : > { %v3548_v27 = vsub.s32 0, %v5267_v11 }
 0x4ae   : > { %v3434_v28 = vpack.c.bf16 %v3433_v59, %v3433_v59  ;;  %v6551_v59 = vld [vmem:[%s5081_s29 + $0x58] sm:$0xff]  }
 0x4b0   : > { %4596 = vmatmul.mubr.bf16.vlgmr.msra.gmra.mrb[160].mxu0 %v3434_v28  ;;  %v6566_v28 = vld [vmem:[%s5081_s29 + $0x70] sm:$0xff]  }
 0x583   : > { %v3534_v33 = vpop.f32.mrb[160].mxu0 }
 0x584   : > { %v3535_v40 = vadd.f32 %v3534_v33, %v3451_v17  ;;  %v4597_v45 = vpop.f32.mrb[161].mxu0  ;;  %v6531_v17 = vld [vmem:[%s5081_s29 + $0x38] sm:$0xff]  }
 0x585   : > { %v3537_v37 = vpop.f32.mrb[162].mxu0  ;;  %v6536_v45 = vld [vmem:[%s5081_s29 + $0x40] sm:$0xff]  }
 0x586   : > { %v4173_v22 = vmul.f32 -1.442695, %v3535_v40  ;;  %v4598_v58 = vpop.f32.mrb[163].mxu0 }
 0x587   : > { %v6541_v58 = vld [vmem:[%s5081_s29 + $0x48] sm:$0xff]  }
 0x588   : > { %4868 = vpow2.f32 %v4173_v22  ;;  %v6571_v22 = vld [vmem:[%s5081_s29 + $0x78] sm:$0xff]  }
 0x592   : > { %v4869_v1 = vpop.eup %4868 }
 0x593   : > { %v3543_v63 = vadd.f32 1.0, %v4869_v1 }
 0x595   : > { %4870 = vrcp.f32 %v3543_v63  ;;  %v6546_v63 = vld [vmem:[%s5081_s29 + $0x50] sm:$0xff]   ;;  %s377_s29 = sand.u32 1, %s4942_s18  }
 0x596   : > { %s3791_s13 = sshll.u32 %s377_s29, 8  ;;  %s6799_s0 = scalar_lea.sflag [#allocation3], %s377_s29 }
 0x597   : > { %s6706_s15 = scalar_lea.vmem [#allocation2], %s3791_s13  ;;  %s4894_s13 = scalar_lea.vmem %s4893_s12, 8192 }
 0x598   : > { %s3725_s16 = sshll.u32 %s6706_s15, 4  ;;  %s6767_s16 = int_to_ptr.vmem [resolvable:$true] %s3725_s16 }
 0x599   : > { %s4888_s25 = scalar_lea.vmem %s6767_s16, 4096  ;;  %p4895_p0 = scmp.lt.s32.totalorder %s6767_s16, %s4893_s12 }
 0x59a   : > { %p4889_p11 = scmp.ne.s32.totalorder %s6767_s16, %s4888_s25  ;;  %p4896_p1 = scmp.lt.s32.totalorder %s4894_s13, %s4888_s25 }
 0x59c   : > { %p4890_p12 = pnand %p4889_p11, %p5057_p5  ;;  %p4897_p2 = por %p4896_p1, %p4895_p0 }
 0x59e   : > { %p4891_p13 = pneg %p4890_p12 }
 0x59f   : > { %v4871_v40 = vpop.eup %4870 }
 0x5a0   : > { %v3549_v6 = vrot.slane %v4871_v40, %v3548_v27  ;;  %p4898_p3 = pnand %p4897_p2, %p4891_p13 }
 0x5a2   : > { %v3550_v1 = vmul.f32 %v3549_v6, %v6344_v47  ;;  %v3551_v18 = vmul.f32 %v3549_v6, %v6337_v0  ;;  %v3552_v33 = vmul.f32 %v3549_v6, %v6353_v16  ;;  %v3553_v27 = vmul.f32 %v3549_v6, %v6361_v25 }
 0x5a3   : > { %v3554_v40 = vmul.f32 %v3549_v6, %v6364_v5  ;;  %v3555_v30 = vmul.f32 %v3549_v6, %v6373_v23  ;;  %v3556_v37 = vmul.f32 %v3549_v6, %v6381_v44  ;;  %v3557_v21 = vmul.f32 %v3549_v6, %v6389_v55 }
 0x5a4   : > { %v3558_v49 = vmul.f32 %v3549_v6, %v6392_v26  ;;  %v3559_v11 = vmul.f32 %v3549_v6, %v6397_v34  ;;  %v3560_v47 = vmul.f32 %v3549_v6, %v6401_v14  ;;  %v3561_v0 = vmul.f32 %v3549_v6, %v6405_v29 }
 0x5a5   : > { %v3562_v16 = vmul.f32 %v3549_v6, %v6408_v50  ;;  %v3563_v25 = vmul.f32 %v3549_v6, %v6413_v38  ;;  %v3564_v5 = vmul.f32 %v3549_v6, %v6417_v56  ;;  %v3565_v23 = vmul.f32 %v3549_v6, %v6421_v24 }
 0x5a6   : > { %v3566_v44 = vmul.f32 %v3549_v6, %v6424_v15  ;;  %v3567_v55 = vmul.f32 %v3549_v6, %v6429_v35  ;;  %v3568_v26 = vmul.f32 %v3549_v6, %v6433_v32  ;;  %v3569_v34 = vmul.f32 %v3549_v6, %v6437_v52 }
 0x5a7   : > { %v3570_v14 = vmul.f32 %v3549_v6, %v6440_v60  ;;  %v3571_v29 = vmul.f32 %v3549_v6, %v6445_v54  ;;  %v3572_v50 = vmul.f32 %v3549_v6, %v6449_v2  ;;  %v3573_v38 = vmul.f32 %v3549_v6, %v6453_v42 }
 0x5a8   : > { %v3574_v56 = vmul.f32 %v3549_v6, %v6456_v53  ;;  %v3575_v24 = vmul.f32 %v3549_v6, %v6461_v61  ;;  %v3576_v15 = vmul.f32 %v3549_v6, %v6465_v12  ;;  %v3577_v35 = vmul.f32 %v3549_v6, %v6469_v7 }
 0x5a9   : > { %v3578_v32 = vmul.f32 %v3549_v6, %v6472_v13  ;;  %v3579_v52 = vmul.f32 %v3549_v6, %v6477_v46  ;;  %v3580_v60 = vmul.f32 %v3549_v6, %v6480_v39  ;;  %v3581_v54 = vmul.f32 %v3549_v6, %v6484_v9 }
 0x5aa   : > { %v3614_v2 = vadd.f32 %v3582_v10, %v3550_v1  ;;  %v3615_v42 = vadd.f32 %v3583_v20, %v3551_v18  ;;  %v3616_v53 = vadd.f32 %v3584_v19, %v3552_v33  ;;  %v3617_v61 = vadd.f32 %v3585_v51, %v3553_v27 }
 0x5ab   : > { %v3618_v12 = vadd.f32 %v3586_v3, %v3554_v40  ;;  %v6916_v7 = vunpack.c.h.bf16 %v6505_v57  ;;  %v6917_v46 = vunpack.c.l.bf16 %v6510_v4  ;;  %v6918_v9 = vunpack.c.h.bf16 %v6510_v4 }
 0x5ac   : > { %v6919_v10 = vunpack.c.l.bf16 %v6515_v48  ;;  %v6920_v19 = vunpack.c.h.bf16 %v6515_v48  ;;  %v6921_v51 = vunpack.c.l.bf16 %v6520_v62  ;;  %v6922_v3 = vunpack.c.h.bf16 %v6520_v62 }
 0x5ad   : > { %v3619_v13 = vadd.f32 %v6916_v7, %v3555_v30  ;;  %v3620_v39 = vadd.f32 %v6917_v46, %v3556_v37  ;;  %v3621_v8 = vadd.f32 %v6918_v9, %v3557_v21  ;;  %v6923_v57 = vunpack.c.l.bf16 %v6525_v31 }
 0x5ae   : > { %v3622_v20 = vadd.f32 %v6919_v10, %v3558_v49  ;;  %v3623_v43 = vadd.f32 %v6920_v19, %v3559_v11  ;;  %v3624_v18 = vadd.f32 %v6921_v51, %v3560_v47  ;;  %v3625_v6 = vadd.f32 %v6922_v3, %v3561_v0 }
 0x5af   : > { %v3626_v30 = vadd.f32 %v6923_v57, %v3562_v16  ;;  %v6924_v33 = vunpack.c.h.bf16 %v6525_v31  ;;  %v6925_v4 = vunpack.c.l.bf16 %v6531_v17  ;;  %v6926_v49 = vunpack.c.h.bf16 %v6531_v17 }
 0x5b0   : > { %v6927_v48 = vunpack.c.l.bf16 %v6536_v45  ;;  %v6928_v62 = vunpack.c.h.bf16 %v6536_v45  ;;  %v6929_v40 = vunpack.c.l.bf16 %v6541_v58  ;;  %v6930_v47 = vunpack.c.h.bf16 %v6541_v58 }
 0x5b1   : > { %v3627_v37 = vadd.f32 %v6924_v33, %v3563_v25  ;;  %v3628_v21 = vadd.f32 %v6925_v4, %v3564_v5  ;;  %v3629_v1 = vadd.f32 %v6926_v49, %v3565_v23  ;;  %v6931_v17 = vunpack.c.l.bf16 %v6546_v63 }
 0x5b2   : > { %v6644_v11 = vadd.f32 %v6927_v48, %v3566_v44  ;;  %v6648_v27 = vadd.f32 %v6928_v62, %v3567_v55  ;;  %v6652_v31 = vadd.f32 %v6929_v40, %v3568_v26  ;;  %v6656_v0 = vadd.f32 %v6930_v47, %v3569_v34 }
 0x5b3   : > { %v6660_v16 = vadd.f32 %v6931_v17, %v3570_v14  ;;  %v6932_v25 = vunpack.c.h.bf16 %v6546_v63  ;;  %v6933_v45 = vunpack.c.l.bf16 %v6551_v59  ;;  %v6934_v44 = vunpack.c.h.bf16 %v6551_v59 }
 0x5b4   : > { %v6935_v58 = vunpack.c.l.bf16 %v6556_v41  ;;  %v6936_v34 = vunpack.c.h.bf16 %v6556_v41  ;;  %v6937_v63 = vunpack.c.l.bf16 %v6561_v36  ;;  %v6938_v7 = vunpack.c.h.bf16 %v6561_v36 }
 0x5b5   : > { %v6664_v5 = vadd.f32 %v6932_v25, %v3571_v29  ;;  %v6668_v23 = vadd.f32 %v6933_v45, %v3572_v50  ;;  %v6672_v55 = vadd.f32 %v6934_v44, %v3573_v38  ;;  %v6939_v59 = vunpack.c.l.bf16 %v6566_v28 }
 0x5b6   : > { %v6676_v26 = vadd.f32 %v6935_v58, %v3574_v56  ;;  %v6680_v14 = vadd.f32 %v6936_v34, %v3575_v24  ;;  %v6684_v29 = vadd.f32 %v6937_v63, %v3576_v15  ;;  %v6688_v50 = vadd.f32 %v6938_v7, %v3577_v35 }
 0x5b7   : > { %v6692_v38 = vadd.f32 %v6939_v59, %v3578_v32  ;;  %v6940_v46 = vunpack.c.h.bf16 %v6566_v28  ;;  %v6941_v41 = vunpack.c.l.bf16 %v6571_v22  ;;  %v6942_v9 = vunpack.c.h.bf16 %v6571_v22 }
 0x5b8   : > { %v3646_v10 = vmax.f32 %v3614_v2, 0.0  ;;  %v3647_v36 = vmax.f32 %v3615_v42, 0.0  ;;  %v3648_v35 = vmax.f32 %v3616_v53, 0.0  ;;  %v3649_v19 = vmax.f32 %v3617_v61, 0.0 }
 0x5b9   : > { %v6696_v56 = vadd.f32 %v6940_v46, %v3579_v52  ;;  %v6700_v24 = vadd.f32 %v6941_v41, %v3580_v60  ;;  %v6704_v15 = vadd.f32 %v6942_v9, %v3581_v54  ;;  %v3650_v51 = vmax.f32 %v3618_v12, 0.0 }
 0x5ba   : > { %v3651_v3 = vmax.f32 %v3619_v13, 0.0  ;;  %v3652_v32 = vmax.f32 %v3620_v39, 0.0  ;;  %v3653_v57 = vmax.f32 %v3621_v8, 0.0  ;;  %v3654_v33 = vmax.f32 %v3622_v20, 0.0  ;;  %3679 = vst.msk [vmem:[%s6706_s15] sm:$0xff] %vm3678_vm5, %v3646_v10  ;;  %3680 = vst.msk [vmem:[%s6706_s15 + $0x8] sm:$0xff] %vm3678_vm5, %v3647_v36 }
 0x5bb   : > { %v3655_v28 = vmax.f32 %v3623_v43, 0.0  ;;  %v3656_v52 = vmax.f32 %v3624_v18, 0.0  ;;  %v3657_v4 = vmax.f32 %v3625_v6, 0.0  ;;  %3681 = vst.msk [vmem:[%s6706_s15 + $0x10] sm:$0xff] %vm3678_vm5, %v3648_v35  ;;  %3682 = vst.msk [vmem:[%s6706_s15 + $0x18] sm:$0xff] %vm3678_vm5, %v3649_v19  ;;  %v3658_v22 = vmax.f32 %v3626_v30, 0.0 }
 0x5bc   : > { %v3659_v60 = vmax.f32 %v3627_v37, 0.0  ;;  %v3660_v54 = vmax.f32 %v3628_v21, 0.0  ;;  %v3661_v2 = vmax.f32 %v3629_v1, 0.0  ;;  %3683 = vst.msk [vmem:[%s6706_s15 + $0x20] sm:$0xff] %vm3678_vm5, %v3650_v51  ;;  %3684 = vst.msk [vmem:[%s6706_s15 + $0x28] sm:$0xff] %vm3678_vm5, %v3651_v3  ;;  %v3662_v42 = vmax.f32 %v6644_v11, 0.0 }
 0x5bd   : > { %3685 = vst.msk [vmem:[%s6706_s15 + $0x30] sm:$0xff] %vm3678_vm5, %v3652_v32  ;;  %3686 = vst.msk [vmem:[%s6706_s15 + $0x38] sm:$0xff] %vm3678_vm5, %v3653_v57  ;;  %v3663_v53 = vmax.f32 %v6648_v27, 0.0  ;;  %v3664_v61 = vmax.f32 %v6652_v31, 0.0  ;;  %v3665_v12 = vmax.f32 %v6656_v0, 0.0  ;;  %v3666_v13 = vmax.f32 %v6660_v16, 0.0 }
 0x5be   : > { %3687 = vst.msk [vmem:[%s6706_s15 + $0x40] sm:$0xff] %vm3678_vm5, %v3654_v33  ;;  %3688 = vst.msk [vmem:[%s6706_s15 + $0x48] sm:$0xff] %vm3678_vm5, %v3655_v28  ;;  %v3667_v39 = vmax.f32 %v6664_v5, 0.0  ;;  %v3668_v8 = vmax.f32 %v6668_v23, 0.0  ;;  %v3669_v20 = vmax.f32 %v6672_v55, 0.0  ;;  %v3670_v43 = vmax.f32 %v6676_v26, 0.0 }
 0x5bf   : > { %3689 = vst.msk [vmem:[%s6706_s15 + $0x50] sm:$0xff] %vm3678_vm5, %v3656_v52  ;;  %3690 = vst.msk [vmem:[%s6706_s15 + $0x58] sm:$0xff] %vm3678_vm5, %v3657_v4  ;;  %v3671_v18 = vmax.f32 %v6680_v14, 0.0  ;;  %v3672_v6 = vmax.f32 %v6684_v29, 0.0  ;;  %v3673_v30 = vmax.f32 %v6688_v50, 0.0  ;;  %v3674_v37 = vmax.f32 %v6692_v38, 0.0 }
 0x5c0   : > { %3691 = vst.msk [vmem:[%s6706_s15 + $0x60] sm:$0xff] %vm3678_vm5, %v3658_v22  ;;  %3692 = vst.msk [vmem:[%s6706_s15 + $0x68] sm:$0xff] %vm3678_vm5, %v3659_v60  ;;  %v3675_v21 = vmax.f32 %v6696_v56, 0.0  ;;  %v3676_v49 = vmax.f32 %v6700_v24, 0.0  ;;  %v3677_v1 = vmax.f32 %v6704_v15, 0.0 }
 0x5c1   : > { %3693 = vst.msk [vmem:[%s6706_s15 + $0x70] sm:$0xff] %vm3678_vm5, %v3660_v54  ;;  %3694 = vst.msk [vmem:[%s6706_s15 + $0x78] sm:$0xff] %vm3678_vm5, %v3661_v2 }
 0x5c2   : > { %3695 = vst.msk [vmem:[%s6706_s15 + $0x80] sm:$0xff] %vm3678_vm5, %v3662_v42  ;;  %3696 = vst.msk [vmem:[%s6706_s15 + $0x88] sm:$0xff] %vm3678_vm5, %v3663_v53 }
 0x5c3   : > { %3697 = vst.msk [vmem:[%s6706_s15 + $0x90] sm:$0xff] %vm3678_vm5, %v3664_v61  ;;  %3698 = vst.msk [vmem:[%s6706_s15 + $0x98] sm:$0xff] %vm3678_vm5, %v3665_v12 }
 0x5c4   : > { %3699 = vst.msk [vmem:[%s6706_s15 + $0xa0] sm:$0xff] %vm3678_vm5, %v3666_v13  ;;  %3700 = vst.msk [vmem:[%s6706_s15 + $0xa8] sm:$0xff] %vm3678_vm5, %v3667_v39 }
 0x5c5   : > { %3701 = vst.msk [vmem:[%s6706_s15 + $0xb0] sm:$0xff] %vm3678_vm5, %v3668_v8  ;;  %3702 = vst.msk [vmem:[%s6706_s15 + $0xb8] sm:$0xff] %vm3678_vm5, %v3669_v20 }
 0x5c6   : > { %3703 = vst.msk [vmem:[%s6706_s15 + $0xc0] sm:$0xff] %vm3678_vm5, %v3670_v43  ;;  %3704 = vst.msk [vmem:[%s6706_s15 + $0xc8] sm:$0xff] %vm3678_vm5, %v3671_v18 }
 0x5c7   : > { %3705 = vst.msk [vmem:[%s6706_s15 + $0xd0] sm:$0xff] %vm3678_vm5, %v3672_v6  ;;  %3706 = vst.msk [vmem:[%s6706_s15 + $0xd8] sm:$0xff] %vm3678_vm5, %v3673_v30 }
 0x5c8   : > { %3707 = vst.msk [vmem:[%s6706_s15 + $0xe0] sm:$0xff] %vm3678_vm5, %v3674_v37  ;;  %3708 = vst.msk [vmem:[%s6706_s15 + $0xe8] sm:$0xff] %vm3678_vm5, %v3675_v21 }
 0x5c9   : > { %3709 = vst.msk [vmem:[%s6706_s15 + $0xf0] sm:$0xff] %vm3678_vm5, %v3676_v49  ;;  %3710 = vst.msk [vmem:[%s6706_s15 + $0xf8] sm:$0xff] %vm3678_vm5, %v3677_v1 }
 0x5ca   : > { %4901 = shalt.err (!%p4898_p3)
}
 0x5cb   : > { %s4902_s29 = scalar_lea.hbm %s6765_s24, 4096  ;;  %s4906_s21 = scalar_lea.hbm %s6851_s11, 8192 }
 0x5cc   : > { %p4903_p4 = scmp.ne.s32.totalorder %s6765_s24, %s4902_s29  ;;  %p4907_p9 = scmp.lt.u32.totalorder %s6765_s24, %s6851_s11 }
 0x5cd   : > { %p4908_p10 = scmp.lt.u32.totalorder %s4906_s21, %s4902_s29  ;;  %p4910_p12 = scmp.lt.u32.totalorder %s4902_s29, %s6765_s24 }
 0x5ce   : > { %p4904_p7 = pnand %p4903_p4, %p5057_p5 }
 0x5cf   : > { %p4909_p11 = por %p4908_p10, %p4907_p9 }
 0x5d0   : > { %p4905_p8 = pneg %p4904_p7 }
 0x5d1   : > { %p4911_p13 = por %p4910_p12, %p4909_p11 }
 0x5d3   : > { %p4912_p0 = pnand %p4911_p13, %p4905_p8 }
 0x5d5   : > { %4915 = shalt.err (!%p4912_p0)
}
 0x5d6   : > { %s4957_s25 = smov 128   ;;  %s4958_s12 = smov 8  }
 0x5d7   : > { %4663 = dma.vmem_to_hbm [thread:$0]  (%p5057_p5), %s6767_s16, 4096, %s6765_s24, %s6799_s0, %s4957_s25, %s4957_s25, %s4958_s12  }
 0x5d8 PF: > { %p4669_p1 = scmp.ge.s32.totalorder %s4950_s20, 2  ;;  %s3740_s13 = sand.u32 1, %s4938_s17  }
 0x5d9   : > { %s3741_s29 = scalar_lea.sflag [#allocation3], %s3740_s13 }
 0x5da   : > { %p4666_p2 = pnand %p4669_p1, %p5061_p6 }
 0x5dc   : > { %4933 = dma.done.wait (!%p4666_p2), %s3741_s29, 4096  }
 0x5dd   : > { %4935 = vsyncadd (!%p4666_p2), %s3741_s29, 4294963200  ;;  %p21_p3 = scmp.ge.s32.totalorder %s5044_s23, 4   ;;  %s6943_s17 = smov %s4942_s18 }
 0x5de   : > { %s6944_s18 = smov %s4946_s19  ;;  %s6945_s19 = smov %s5055_s26 }
 0x5df   : > { %s6946_s20 = smov %s5044_s23  ;;  %23 = sbr.rel (!%p21_p3) target bundleno = 5 (0x5), region = 99 }
 0x5e6   :  { %3746 = vsyncpa [#allocation3], 1 }
 0x5e7   :  { %3748 = vsyncpa [#allocation3 + $0x1], 1 }

</bundles_post_ra>
